<compile_context>
chip_gen: v7x
topology: tpu7x:2x2x1
jax: 0.10.0
libtpu: 0.0.40
codegen_flags: <defaults>
</compile_context>

<pallas_src>
import functools

import jax
import jax.numpy as jnp
from jax.experimental import pallas as pl
from jax.experimental.pallas import tpu as pltpu


# ----------------------------- Model config --------------------------------

VOCAB_SIZE = 100
HIDDEN = 32
NUM_LAYERS = 2
NUM_HEADS = 2
HEAD_DIM = HIDDEN // NUM_HEADS
INTERMEDIATE = 64
MAX_POS = 16
TYPE_VOCAB = 2
NUM_CLASS = 3
CONFOUNDER_LEN = 2          # meta_classifier output size
LN_EPS = 1e-12
ATTN_SCALE = 1.0 / (HEAD_DIM ** 0.5)

SLAB_W = 128                              # lane-dense column width of packed slabs
LAYER_WROWS = 32 + 32 + 32 + 64           # qkv_w + o_w + i_w + f_w rows per layer
POOL_WROW = NUM_LAYERS * LAYER_WROWS      # 320
CLSMETA_WROW = POOL_WROW + 32             # 352
TOTAL_WROWS = CLSMETA_WROW + 32           # 384


# ----------------------------- Fused Pallas kernel -------------------------

def _layernorm(x, g, b):
    mean = jnp.mean(x, axis=-1, keepdims=True)
    var = jnp.mean((x - mean) ** 2, axis=-1, keepdims=True)
    inv = jax.lax.rsqrt(var + LN_EPS)
    return (x - mean) * inv * g + b


def _gelu(y):
    # TODO(synk): HF BERT default is erf-GELU; tanh approximation used here
    # (EUP-friendly, guaranteed to lower in Mosaic). Logits differ slightly.
    return 0.5 * y * (1.0 + jnp.tanh(0.7978845608028654 * (y + 0.044715 * y * y * y)))


def _bert_fused_kernel(emb_ref, mask_ref, w_ref, v_ref, out_ref, *, batch, seq):
    B, S = batch, seq
    H, NH, DH, IM = HIDDEN, NUM_HEADS, HEAD_DIM, INTERMEDIATE
    N = B * S
    bf16 = jnp.bfloat16
    f32 = jnp.float32

    def vec(row, width):                     # (1, width) f32 bias / LN row
        return v_ref[row:row + 1, 0:width]

    def mat(row, rows, cols):                # bf16 weight block
        return w_ref[row:row + rows, 0:cols]

    mask_add = mask_ref[...]                 # (N, N) block-diag batch + key-pad mask

    # --- embedding LayerNorm ------------------------------------------------
    h = _layernorm(emb_ref[...], vec(0, H), vec(1, H))          # (N, H) f32

    # --- encoder layers (statically unrolled, all weights VMEM-resident) ----
    for l in range(NUM_LAYERS):
        wbase = l * LAYER_WROWS
        vbase = 2 + l * 8

        # fused QKV projection: (N, 3H)
        qkv = jnp.dot(h.astype(bf16), mat(wbase, H, 3 * H),
                      preferred_element_type=f32) + vec(vbase + 0, 3 * H)

        # per-head attention over the WHOLE batch (cross-batch masked out):
        # one score matmul + one softmax + one context matmul per head.
        ctx_heads = []
        for hd in range(NH):
            c = hd * DH
            q_h = qkv[:, c:c + DH].astype(bf16)                  # (N, DH)
            k_h = qkv[:, H + c:H + c + DH].astype(bf16)
            v_h = qkv[:, 2 * H + c:2 * H + c + DH].astype(bf16)
            s = jax.lax.dot_general(q_h, k_h, (((1,), (1,)), ((), ())),
                                    preferred_element_type=f32)  # (N, N)
            s = s * ATTN_SCALE + mask_add                        # mask BEFORE max-sub
            s = s - jnp.max(s, axis=-1, keepdims=True)
            p = jnp.exp(s)
            p = p * pl.reciprocal(jnp.sum(p, axis=-1, keepdims=True), approx=True)
            ctx_heads.append(jnp.dot(p.astype(bf16), v_h,
                                     preferred_element_type=f32))  # (N, DH)
        ctx = jnp.concatenate(ctx_heads, axis=1)                 # (N, H), registers only

        # output projection + residual + LN1
        attn_out = jnp.dot(ctx.astype(bf16), mat(wbase + 32, H, H),
                           preferred_element_type=f32) + vec(vbase + 1, H)
        h = _layernorm(h + attn_out, vec(vbase + 2, H), vec(vbase + 3, H))

        # FFN (GELU) + residual + LN2
        inter = _gelu(jnp.dot(h.astype(bf16), mat(wbase + 64, H, IM),
                              preferred_element_type=f32) + vec(vbase + 4, IM))
        ffn = jnp.dot(inter.astype(bf16), mat(wbase + 96, IM, H),
                      preferred_element_type=f32) + vec(vbase + 5, H)
        h = _layernorm(h + ffn, vec(vbase + 6, H), vec(vbase + 7, H))

    # --- pooler + fused classifier/meta-classifier epilogue ------------------
    cls_rows = jnp.concatenate([h[b * S:b * S + 1, :] for b in range(B)], axis=0)  # (B, H)
    pooled = jnp.tanh(jnp.dot(cls_rows.astype(bf16), mat(POOL_WROW, H, H),
                              preferred_element_type=f32) + vec(2 + 8 * NUM_LAYERS, H))
    clsmeta = jnp.dot(pooled.astype(bf16),
                      mat(CLSMETA_WROW, H, NUM_CLASS + CONFOUNDER_LEN),
                      preferred_element_type=f32) + vec(3 + 8 * NUM_LAYERS,
                                                        NUM_CLASS + CONFOUNDER_LEN)
    # single lane-dense output slab: [pooled | logits | meta | zero pad]
    pad_w = SLAB_W - H - NUM_CLASS - CONFOUNDER_LEN
    out_ref[...] = jnp.concatenate(
        [pooled, clsmeta, jnp.zeros((B, pad_w), f32)], axis=1)


# ----------------------------- Parameters ----------------------------------

def _w(key, shape):
    return (0.02 * jax.random.normal(key, shape)).astype(jnp.float32)


def init_params(key):
    keys = iter(jax.random.split(key, 8 + NUM_LAYERS * 8))
    params = {
        "word_emb": _w(next(keys), (VOCAB_SIZE, HIDDEN)),
        "pos_emb": _w(next(keys), (MAX_POS, HIDDEN)),
        "type_emb": _w(next(keys), (TYPE_VOCAB, HIDDEN)),
        "emb_ln_g": jnp.ones((HIDDEN,), jnp.float32),
        "emb_ln_b": jnp.zeros((HIDDEN,), jnp.float32),
        "pool_w": _w(next(keys), (HIDDEN, HIDDEN)),
        "pool_b": jnp.zeros((HIDDEN,), jnp.float32),
        "cls_w": _w(next(keys), (HIDDEN, NUM_CLASS)),
        "cls_b": jnp.zeros((NUM_CLASS,), jnp.float32),
        "meta_w": _w(next(keys), (HIDDEN, CONFOUNDER_LEN)),
        "meta_b": jnp.zeros((CONFOUNDER_LEN,), jnp.float32),
        "layers": [],
    }
    for _ in range(NUM_LAYERS):
        params["layers"].append({
            "q_w": _w(next(keys), (HIDDEN, HIDDEN)), "q_b": jnp.zeros((HIDDEN,), jnp.float32),
            "k_w": _w(next(keys), (HIDDEN, HIDDEN)), "k_b": jnp.zeros((HIDDEN,), jnp.float32),
            "v_w": _w(next(keys), (HIDDEN, HIDDEN)), "v_b": jnp.zeros((HIDDEN,), jnp.float32),
            "o_w": _w(next(keys), (HIDDEN, HIDDEN)), "o_b": jnp.zeros((HIDDEN,), jnp.float32),
            "ln1_g": jnp.ones((HIDDEN,), jnp.float32), "ln1_b": jnp.zeros((HIDDEN,), jnp.float32),
            "i_w": _w(next(keys), (HIDDEN, INTERMEDIATE)), "i_b": jnp.zeros((INTERMEDIATE,), jnp.float32),
            "f_w": _w(next(keys), (INTERMEDIATE, HIDDEN)), "f_b": jnp.zeros((HIDDEN,), jnp.float32),
            "ln2_g": jnp.ones((HIDDEN,), jnp.float32), "ln2_b": jnp.zeros((HIDDEN,), jnp.float32),
        })
    return params


def pack_params(params):
    """One-time packing: ALL matmul weights into one (384,128) bf16 slab; all
    biases / LayerNorm params into one (24,128) f32 slab; QKV fused; cls+meta fused."""
    L = NUM_LAYERS
    lyr = params["layers"]

    def pad_cols(w):
        return jnp.pad(w, ((0, 0), (0, SLAB_W - w.shape[1])))

    wblocks = []
    for l in range(L):
        qkv_w = jnp.concatenate([lyr[l]["q_w"], lyr[l]["k_w"], lyr[l]["v_w"]], axis=1)
        wblocks += [pad_cols(qkv_w), pad_cols(lyr[l]["o_w"]),
                    pad_cols(lyr[l]["i_w"]), pad_cols(lyr[l]["f_w"])]
    wblocks += [pad_cols(params["pool_w"]),
                pad_cols(jnp.concatenate([params["cls_w"], params["meta_w"]], axis=1))]
    wslab = jnp.concatenate(wblocks, axis=0).astype(jnp.bfloat16)     # (384, 128)

    def vrow(v):
        v = v.reshape(1, -1)
        return jnp.pad(v, ((0, 0), (0, SLAB_W - v.shape[1])))

    vrows = [vrow(params["emb_ln_g"]), vrow(params["emb_ln_b"])]
    for l in range(L):
        qkv_b = jnp.concatenate([lyr[l]["q_b"], lyr[l]["k_b"], lyr[l]["v_b"]])
        vrows += [vrow(qkv_b), vrow(lyr[l]["o_b"]), vrow(lyr[l]["ln1_g"]), vrow(lyr[l]["ln1_b"]),
                  vrow(lyr[l]["i_b"]), vrow(lyr[l]["f_b"]), vrow(lyr[l]["ln2_g"]), vrow(lyr[l]["ln2_b"])]
    vrows += [vrow(params["pool_b"]),
              vrow(jnp.concatenate([params["cls_b"], params["meta_b"]]))]
    nrows = len(vrows)
    pad = (-nrows) % 8
    vslab = jnp.concatenate(vrows + [jnp.zeros((pad, SLAB_W), jnp.float32)], axis=0)

    return {
        "word_emb": params["word_emb"],
        "pos_emb": params["pos_emb"],
        "type_emb": params["type_emb"],
        "wslab": wslab,
        "vslab": vslab,
    }


# ----------------------------- Forward pass ---------------------------------

def basic_bert_forward(packed, input_ids, attention_mask, token_type_ids):
    """Mirrors BasicBertModel.forward: returns (logits, pooled_output, meta_logits)."""
    B, S = input_ids.shape
    N = B * S

    # Embedding gathers stay in plain JAX (glue); everything else is one fused kernel.
    emb = (packed["word_emb"][input_ids]
           + packed["pos_emb"][:S][None, :, :]
           + packed["type_emb"][token_type_ids]).reshape(N, HIDDEN)

    # Block-diagonal (cross-batch) + key-padding additive mask, shared by all heads.
    row_b = jnp.repeat(jnp.arange(B), S)
    same_batch = row_b[:, None] == row_b[None, :]                        # (N, N)
    pad_add = (1.0 - attention_mask.astype(jnp.float32)) * -10000.0      # (B, S)
    pad_add = jnp.broadcast_to(pad_add.reshape(1, N), (N, N))
    mask_add = jnp.where(same_batch, pad_add, -1e9).astype(jnp.float32)  # (N, N)

    flops = (NUM_LAYERS * (2 * N * HIDDEN * 3 * HIDDEN
                           + NUM_HEADS * 4 * N * N * HEAD_DIM
                           + 2 * N * HIDDEN * HIDDEN
                           + 4 * N * HIDDEN * INTERMEDIATE)
             + 2 * B * HIDDEN * (HIDDEN + NUM_CLASS + CONFOUNDER_LEN))
    transcendentals = (NUM_LAYERS * (NUM_HEADS * N * N + N * INTERMEDIATE)
                       + B * HIDDEN)
    bytes_accessed = (emb.size * 4 + mask_add.size * 4
                      + packed["wslab"].size * 2 + packed["vslab"].size * 4
                      + B * SLAB_W * 4)

    kernel = functools.partial(_bert_fused_kernel, batch=B, seq=S)
    out = pl.pallas_call(
        kernel,
        out_shape=jax.ShapeDtypeStruct((B, SLAB_W), jnp.float32),
        cost_estimate=pl.CostEstimate(flops=flops,
                                      transcendentals=transcendentals,
                                      bytes_accessed=bytes_accessed),
    )(emb, mask_add, packed["wslab"], packed["vslab"])

    pooled = out[:, :HIDDEN]
    logits = out[:, HIDDEN:HIDDEN + NUM_CLASS]
    meta_logits = out[:, HIDDEN + NUM_CLASS:HIDDEN + NUM_CLASS + CONFOUNDER_LEN]
    return logits, pooled, meta_logits


def get_pseudo_prediction(meta_logits):
    """Mirrors BasicBertModel.get_pseudo_prediction: meta logits already computed in the
    fused kernel epilogue; top-1 (argmax) stays in JAX glue."""
    pseudo_gid = jnp.argmax(meta_logits, axis=-1)
    return meta_logits, pseudo_gid


# ----------------------------- Main ------------------------------------------

if __name__ == "__main__":
    key = jax.random.PRNGKey(0)
    pkey, dkey = jax.random.split(key)
    params = init_params(pkey)
    packed = pack_params(params)

    B, S = 2, 8
    input_ids = jax.random.randint(dkey, (B, S), 0, VOCAB_SIZE, dtype=jnp.int32)
    attention_mask = jnp.ones((B, S), dtype=jnp.int32).at[1, -2:].set(0)
    token_type_ids = jnp.zeros((B, S), dtype=jnp.int32)

    fwd = jax.jit(basic_bert_forward)
    logits, pooled, meta_logits = fwd(packed, input_ids, attention_mask, token_type_ids)
    _, pseudo_gid = get_pseudo_prediction(meta_logits)
    jax.block_until_ready((logits, pooled, meta_logits, pseudo_gid))

    assert logits.shape == (B, NUM_CLASS)
    assert pooled.shape == (B, HIDDEN)
    assert meta_logits.shape == (B, CONFOUNDER_LEN)
    assert pseudo_gid.shape == (B,)
    assert bool(jnp.all(jnp.isfinite(logits))) and bool(jnp.all(jnp.isfinite(pooled)))
    assert bool(jnp.all(jnp.isfinite(meta_logits)))
    print("KERNEL_OK")
</pallas_src>

<mosaic_0001>
module attributes {stable_mosaic.version = 11 : i64} {
  func.func @_bert_fused_kernel(%arg0: memref<16x32xf32, #tpu.memory_space<vmem>>, %arg1: memref<16x16xf32, #tpu.memory_space<vmem>>, %arg2: memref<384x128xbf16, #tpu.memory_space<vmem>>, %arg3: memref<24x128xf32, #tpu.memory_space<vmem>>, %arg4: memref<2x128xf32, #tpu.memory_space<vmem>>) attributes {dimension_semantics = [], scalar_prefetch = 0 : i64, scratch_operands = 0 : i64, tpu.core_type = #tpu.core_type<tc>} {
    %c0 = arith.constant 0 : index
    %c0_0 = arith.constant 0 : index
    %0 = vector.load %arg1[%c0, %c0_0] : memref<16x16xf32, #tpu.memory_space<vmem>>, vector<16x16xf32>
    %c0_1 = arith.constant 0 : index
    %c0_2 = arith.constant 0 : index
    %1 = vector.load %arg0[%c0_1, %c0_2] : memref<16x32xf32, #tpu.memory_space<vmem>>, vector<16x32xf32>
    %c0_3 = arith.constant 0 : index
    %c0_4 = arith.constant 0 : index
    %2 = vector.load %arg3[%c0_3, %c0_4] : memref<24x128xf32, #tpu.memory_space<vmem>>, vector<1x32xf32>
    %c1 = arith.constant 1 : index
    %c0_5 = arith.constant 0 : index
    %3 = vector.load %arg3[%c1, %c0_5] : memref<24x128xf32, #tpu.memory_space<vmem>>, vector<1x32xf32>
    %cst = arith.constant dense<0.000000e+00> : vector<16xf32>
    %4 = vector.multi_reduction <add>, %1, %cst [1] : vector<16x32xf32> to vector<16xf32>
    %5 = vector.shape_cast %4 : vector<16xf32> to vector<16x1xf32>
    %cst_6 = arith.constant 3.200000e+01 : f32
    %6 = vector.broadcast %cst_6 : f32 to vector<16x1xf32>
    %7 = arith.divf %5, %6 : vector<16x1xf32>
    %8 = vector.broadcast %7 : vector<16x1xf32> to vector<16x32xf32>
    %9 = arith.subf %1, %8 : vector<16x32xf32>
    %10 = arith.mulf %9, %9 : vector<16x32xf32>
    %cst_7 = arith.constant dense<0.000000e+00> : vector<16xf32>
    %11 = vector.multi_reduction <add>, %10, %cst_7 [1] : vector<16x32xf32> to vector<16xf32>
    %12 = vector.shape_cast %11 : vector<16xf32> to vector<16x1xf32>
    %cst_8 = arith.constant 3.200000e+01 : f32
    %13 = vector.broadcast %cst_8 : f32 to vector<16x1xf32>
    %14 = arith.divf %12, %13 : vector<16x1xf32>
    %cst_9 = arith.constant 9.99999996E-13 : f32
    %15 = vector.broadcast %cst_9 : f32 to vector<16x1xf32>
    %16 = arith.addf %14, %15 : vector<16x1xf32>
    %17 = math.rsqrt %16 : vector<16x1xf32>
    %18 = vector.broadcast %7 : vector<16x1xf32> to vector<16x32xf32>
    %19 = arith.subf %1, %18 : vector<16x32xf32>
    %20 = vector.broadcast %17 : vector<16x1xf32> to vector<16x32xf32>
    %21 = arith.mulf %19, %20 : vector<16x32xf32>
    %22 = vector.broadcast %2 : vector<1x32xf32> to vector<16x32xf32>
    %23 = arith.mulf %21, %22 : vector<16x32xf32>
    %24 = vector.broadcast %3 : vector<1x32xf32> to vector<16x32xf32>
    %25 = arith.addf %23, %24 : vector<16x32xf32>
    %26 = arith.truncf %25 : vector<16x32xf32> to vector<16x32xbf16>
    %c0_10 = arith.constant 0 : index
    %c0_11 = arith.constant 0 : index
    %27 = vector.load %arg2[%c0_10, %c0_11] : memref<384x128xbf16, #tpu.memory_space<vmem>>, vector<32x96xbf16>
    %cst_12 = arith.constant dense<0.000000e+00> : vector<16x96xf32>
    %28 = tpu.matmul %26, %27, %cst_12 {dimension_numbers = #tpu.dot_dimension_numbers<[1], [0], [0], [1], [0, 0, 1, 1], [], []>} : vector<16x32xbf16>, vector<32x96xbf16>, vector<16x96xf32> -> vector<16x96xf32>
    %c2 = arith.constant 2 : index
    %c0_13 = arith.constant 0 : index
    %29 = vector.load %arg3[%c2, %c0_13] : memref<24x128xf32, #tpu.memory_space<vmem>>, vector<1x96xf32>
    %30 = vector.broadcast %29 : vector<1x96xf32> to vector<16x96xf32>
    %31 = arith.addf %28, %30 : vector<16x96xf32>
    %32 = vector.extract_strided_slice %31 {offsets = [0, 0], sizes = [16, 16], strides = [1, 1]} : vector<16x96xf32> to vector<16x16xf32>
    %33 = arith.truncf %32 : vector<16x16xf32> to vector<16x16xbf16>
    %34 = vector.extract_strided_slice %31 {offsets = [0, 32], sizes = [16, 16], strides = [1, 1]} : vector<16x96xf32> to vector<16x16xf32>
    %35 = arith.truncf %34 : vector<16x16xf32> to vector<16x16xbf16>
    %36 = vector.extract_strided_slice %31 {offsets = [0, 64], sizes = [16, 16], strides = [1, 1]} : vector<16x96xf32> to vector<16x16xf32>
    %37 = arith.truncf %36 : vector<16x16xf32> to vector<16x16xbf16>
    %cst_14 = arith.constant dense<0.000000e+00> : vector<16x16xf32>
    %38 = tpu.matmul %33, %35, %cst_14 {dimension_numbers = #tpu.dot_dimension_numbers<[1], [1], [0], [0], [0, 0, 1, 0], [], []>} : vector<16x16xbf16>, vector<16x16xbf16>, vector<16x16xf32> -> vector<16x16xf32>
    %cst_15 = arith.constant 2.500000e-01 : f32
    %39 = vector.broadcast %cst_15 : f32 to vector<16x16xf32>
    %40 = arith.mulf %38, %39 : vector<16x16xf32>
    %41 = arith.addf %40, %0 : vector<16x16xf32>
    %cst_16 = arith.constant dense<0xFF800000> : vector<16xf32>
    %42 = vector.multi_reduction <maximumf>, %41, %cst_16 [1] : vector<16x16xf32> to vector<16xf32>
    %43 = vector.shape_cast %42 : vector<16xf32> to vector<16x1xf32>
    %44 = vector.broadcast %43 : vector<16x1xf32> to vector<16x16xf32>
    %45 = arith.subf %41, %44 : vector<16x16xf32>
    %46 = math.exp %45 : vector<16x16xf32>
    %cst_17 = arith.constant dense<0.000000e+00> : vector<16xf32>
    %47 = vector.multi_reduction <add>, %46, %cst_17 [1] : vector<16x16xf32> to vector<16xf32>
    %48 = vector.shape_cast %47 : vector<16xf32> to vector<16x1xf32>
    %49 = tpu.reciprocal %48 {approx = true} : vector<16x1xf32> -> vector<16x1xf32>
    %50 = vector.broadcast %49 : vector<16x1xf32> to vector<16x16xf32>
    %51 = arith.mulf %46, %50 : vector<16x16xf32>
    %52 = arith.truncf %51 : vector<16x16xf32> to vector<16x16xbf16>
    %cst_18 = arith.constant dense<0.000000e+00> : vector<16x16xf32>
    %53 = tpu.matmul %52, %37, %cst_18 {dimension_numbers = #tpu.dot_dimension_numbers<[1], [0], [0], [1], [0, 0, 1, 1], [], []>} : vector<16x16xbf16>, vector<16x16xbf16>, vector<16x16xf32> -> vector<16x16xf32>
    %54 = vector.extract_strided_slice %31 {offsets = [0, 16], sizes = [16, 16], strides = [1, 1]} : vector<16x96xf32> to vector<16x16xf32>
    %55 = arith.truncf %54 : vector<16x16xf32> to vector<16x16xbf16>
    %56 = vector.extract_strided_slice %31 {offsets = [0, 48], sizes = [16, 16], strides = [1, 1]} : vector<16x96xf32> to vector<16x16xf32>
    %57 = arith.truncf %56 : vector<16x16xf32> to vector<16x16xbf16>
    %58 = vector.extract_strided_slice %31 {offsets = [0, 80], sizes = [16, 16], strides = [1, 1]} : vector<16x96xf32> to vector<16x16xf32>
    %59 = arith.truncf %58 : vector<16x16xf32> to vector<16x16xbf16>
    %cst_19 = arith.constant dense<0.000000e+00> : vector<16x16xf32>
    %60 = tpu.matmul %55, %57, %cst_19 {dimension_numbers = #tpu.dot_dimension_numbers<[1], [1], [0], [0], [0, 0, 1, 0], [], []>} : vector<16x16xbf16>, vector<16x16xbf16>, vector<16x16xf32> -> vector<16x16xf32>
    %cst_20 = arith.constant 2.500000e-01 : f32
    %61 = vector.broadcast %cst_20 : f32 to vector<16x16xf32>
    %62 = arith.mulf %60, %61 : vector<16x16xf32>
    %63 = arith.addf %62, %0 : vector<16x16xf32>
    %cst_21 = arith.constant dense<0xFF800000> : vector<16xf32>
    %64 = vector.multi_reduction <maximumf>, %63, %cst_21 [1] : vector<16x16xf32> to vector<16xf32>
    %65 = vector.shape_cast %64 : vector<16xf32> to vector<16x1xf32>
    %66 = vector.broadcast %65 : vector<16x1xf32> to vector<16x16xf32>
    %67 = arith.subf %63, %66 : vector<16x16xf32>
    %68 = math.exp %67 : vector<16x16xf32>
    %cst_22 = arith.constant dense<0.000000e+00> : vector<16xf32>
    %69 = vector.multi_reduction <add>, %68, %cst_22 [1] : vector<16x16xf32> to vector<16xf32>
    %70 = vector.shape_cast %69 : vector<16xf32> to vector<16x1xf32>
    %71 = tpu.reciprocal %70 {approx = true} : vector<16x1xf32> -> vector<16x1xf32>
    %72 = vector.broadcast %71 : vector<16x1xf32> to vector<16x16xf32>
    %73 = arith.mulf %68, %72 : vector<16x16xf32>
    %74 = arith.truncf %73 : vector<16x16xf32> to vector<16x16xbf16>
    %cst_23 = arith.constant dense<0.000000e+00> : vector<16x16xf32>
    %75 = tpu.matmul %74, %59, %cst_23 {dimension_numbers = #tpu.dot_dimension_numbers<[1], [0], [0], [1], [0, 0, 1, 1], [], []>} : vector<16x16xbf16>, vector<16x16xbf16>, vector<16x16xf32> -> vector<16x16xf32>
    %76 = tpu.concatenate %53, %75 in 1 : vector<16x16xf32>, vector<16x16xf32> -> vector<16x32xf32>
    %77 = arith.truncf %76 : vector<16x32xf32> to vector<16x32xbf16>
    %c32 = arith.constant 32 : index
    %c0_24 = arith.constant 0 : index
    %78 = vector.load %arg2[%c32, %c0_24] : memref<384x128xbf16, #tpu.memory_space<vmem>>, vector<32x32xbf16>
    %cst_25 = arith.constant dense<0.000000e+00> : vector<16x32xf32>
    %79 = tpu.matmul %77, %78, %cst_25 {dimension_numbers = #tpu.dot_dimension_numbers<[1], [0], [0], [1], [0, 0, 1, 1], [], []>} : vector<16x32xbf16>, vector<32x32xbf16>, vector<16x32xf32> -> vector<16x32xf32>
    %c3 = arith.constant 3 : index
    %c0_26 = arith.constant 0 : index
    %80 = vector.load %arg3[%c3, %c0_26] : memref<24x128xf32, #tpu.memory_space<vmem>>, vector<1x32xf32>
    %81 = vector.broadcast %80 : vector<1x32xf32> to vector<16x32xf32>
    %82 = arith.addf %79, %81 : vector<16x32xf32>
    %83 = arith.addf %25, %82 : vector<16x32xf32>
    %c4 = arith.constant 4 : index
    %c0_27 = arith.constant 0 : index
    %84 = vector.load %arg3[%c4, %c0_27] : memref<24x128xf32, #tpu.memory_space<vmem>>, vector<1x32xf32>
    %c5 = arith.constant 5 : index
    %c0_28 = arith.constant 0 : index
    %85 = vector.load %arg3[%c5, %c0_28] : memref<24x128xf32, #tpu.memory_space<vmem>>, vector<1x32xf32>
    %cst_29 = arith.constant dense<0.000000e+00> : vector<16xf32>
    %86 = vector.multi_reduction <add>, %83, %cst_29 [1] : vector<16x32xf32> to vector<16xf32>
    %87 = vector.shape_cast %86 : vector<16xf32> to vector<16x1xf32>
    %cst_30 = arith.constant 3.200000e+01 : f32
    %88 = vector.broadcast %cst_30 : f32 to vector<16x1xf32>
    %89 = arith.divf %87, %88 : vector<16x1xf32>
    %90 = vector.broadcast %89 : vector<16x1xf32> to vector<16x32xf32>
    %91 = arith.subf %83, %90 : vector<16x32xf32>
    %92 = arith.mulf %91, %91 : vector<16x32xf32>
    %cst_31 = arith.constant dense<0.000000e+00> : vector<16xf32>
    %93 = vector.multi_reduction <add>, %92, %cst_31 [1] : vector<16x32xf32> to vector<16xf32>
    %94 = vector.shape_cast %93 : vector<16xf32> to vector<16x1xf32>
    %cst_32 = arith.constant 3.200000e+01 : f32
    %95 = vector.broadcast %cst_32 : f32 to vector<16x1xf32>
    %96 = arith.divf %94, %95 : vector<16x1xf32>
    %cst_33 = arith.constant 9.99999996E-13 : f32
    %97 = vector.broadcast %cst_33 : f32 to vector<16x1xf32>
    %98 = arith.addf %96, %97 : vector<16x1xf32>
    %99 = math.rsqrt %98 : vector<16x1xf32>
    %100 = vector.broadcast %89 : vector<16x1xf32> to vector<16x32xf32>
    %101 = arith.subf %83, %100 : vector<16x32xf32>
    %102 = vector.broadcast %99 : vector<16x1xf32> to vector<16x32xf32>
    %103 = arith.mulf %101, %102 : vector<16x32xf32>
    %104 = vector.broadcast %84 : vector<1x32xf32> to vector<16x32xf32>
    %105 = arith.mulf %103, %104 : vector<16x32xf32>
    %106 = vector.broadcast %85 : vector<1x32xf32> to vector<16x32xf32>
    %107 = arith.addf %105, %106 : vector<16x32xf32>
    %108 = arith.truncf %107 : vector<16x32xf32> to vector<16x32xbf16>
    %c64 = arith.constant 64 : index
    %c0_34 = arith.constant 0 : index
    %109 = vector.load %arg2[%c64, %c0_34] : memref<384x128xbf16, #tpu.memory_space<vmem>>, vector<32x64xbf16>
    %cst_35 = arith.constant dense<0.000000e+00> : vector<16x64xf32>
    %110 = tpu.matmul %108, %109, %cst_35 {dimension_numbers = #tpu.dot_dimension_numbers<[1], [0], [0], [1], [0, 0, 1, 1], [], []>} : vector<16x32xbf16>, vector<32x64xbf16>, vector<16x64xf32> -> vector<16x64xf32>
    %c6 = arith.constant 6 : index
    %c0_36 = arith.constant 0 : index
    %111 = vector.load %arg3[%c6, %c0_36] : memref<24x128xf32, #tpu.memory_space<vmem>>, vector<1x64xf32>
    %112 = vector.broadcast %111 : vector<1x64xf32> to vector<16x64xf32>
    %113 = arith.addf %110, %112 : vector<16x64xf32>
    %cst_37 = arith.constant 5.000000e-01 : f32
    %114 = vector.broadcast %cst_37 : f32 to vector<16x64xf32>
    %115 = arith.mulf %114, %113 : vector<16x64xf32>
    %cst_38 = arith.constant 4.471500e-02 : f32
    %116 = vector.broadcast %cst_38 : f32 to vector<16x64xf32>
    %117 = arith.mulf %116, %113 : vector<16x64xf32>
    %118 = arith.mulf %117, %113 : vector<16x64xf32>
    %119 = arith.mulf %118, %113 : vector<16x64xf32>
    %120 = arith.addf %113, %119 : vector<16x64xf32>
    %cst_39 = arith.constant 0.797884583 : f32
    %121 = vector.broadcast %cst_39 : f32 to vector<16x64xf32>
    %122 = arith.mulf %121, %120 : vector<16x64xf32>
    %123 = math.tanh %122 : vector<16x64xf32>
    %cst_40 = arith.constant 1.000000e+00 : f32
    %124 = vector.broadcast %cst_40 : f32 to vector<16x64xf32>
    %125 = arith.addf %124, %123 : vector<16x64xf32>
    %126 = arith.mulf %115, %125 : vector<16x64xf32>
    %127 = arith.truncf %126 : vector<16x64xf32> to vector<16x64xbf16>
    %c96 = arith.constant 96 : index
    %c0_41 = arith.constant 0 : index
    %128 = vector.load %arg2[%c96, %c0_41] : memref<384x128xbf16, #tpu.memory_space<vmem>>, vector<64x32xbf16>
    %cst_42 = arith.constant dense<0.000000e+00> : vector<16x32xf32>
    %129 = tpu.matmul %127, %128, %cst_42 {dimension_numbers = #tpu.dot_dimension_numbers<[1], [0], [0], [1], [0, 0, 1, 1], [], []>} : vector<16x64xbf16>, vector<64x32xbf16>, vector<16x32xf32> -> vector<16x32xf32>
    %c7 = arith.constant 7 : index
    %c0_43 = arith.constant 0 : index
    %130 = vector.load %arg3[%c7, %c0_43] : memref<24x128xf32, #tpu.memory_space<vmem>>, vector<1x32xf32>
    %131 = vector.broadcast %130 : vector<1x32xf32> to vector<16x32xf32>
    %132 = arith.addf %129, %131 : vector<16x32xf32>
    %133 = arith.addf %107, %132 : vector<16x32xf32>
    %c8 = arith.constant 8 : index
    %c0_44 = arith.constant 0 : index
    %134 = vector.load %arg3[%c8, %c0_44] : memref<24x128xf32, #tpu.memory_space<vmem>>, vector<1x32xf32>
    %c9 = arith.constant 9 : index
    %c0_45 = arith.constant 0 : index
    %135 = vector.load %arg3[%c9, %c0_45] : memref<24x128xf32, #tpu.memory_space<vmem>>, vector<1x32xf32>
    %cst_46 = arith.constant dense<0.000000e+00> : vector<16xf32>
    %136 = vector.multi_reduction <add>, %133, %cst_46 [1] : vector<16x32xf32> to vector<16xf32>
    %137 = vector.shape_cast %136 : vector<16xf32> to vector<16x1xf32>
    %cst_47 = arith.constant 3.200000e+01 : f32
    %138 = vector.broadcast %cst_47 : f32 to vector<16x1xf32>
    %139 = arith.divf %137, %138 : vector<16x1xf32>
    %140 = vector.broadcast %139 : vector<16x1xf32> to vector<16x32xf32>
    %141 = arith.subf %133, %140 : vector<16x32xf32>
    %142 = arith.mulf %141, %141 : vector<16x32xf32>
    %cst_48 = arith.constant dense<0.000000e+00> : vector<16xf32>
    %143 = vector.multi_reduction <add>, %142, %cst_48 [1] : vector<16x32xf32> to vector<16xf32>
    %144 = vector.shape_cast %143 : vector<16xf32> to vector<16x1xf32>
    %cst_49 = arith.constant 3.200000e+01 : f32
    %145 = vector.broadcast %cst_49 : f32 to vector<16x1xf32>
    %146 = arith.divf %144, %145 : vector<16x1xf32>
    %cst_50 = arith.constant 9.99999996E-13 : f32
    %147 = vector.broadcast %cst_50 : f32 to vector<16x1xf32>
    %148 = arith.addf %146, %147 : vector<16x1xf32>
    %149 = math.rsqrt %148 : vector<16x1xf32>
    %150 = vector.broadcast %139 : vector<16x1xf32> to vector<16x32xf32>
    %151 = arith.subf %133, %150 : vector<16x32xf32>
    %152 = vector.broadcast %149 : vector<16x1xf32> to vector<16x32xf32>
    %153 = arith.mulf %151, %152 : vector<16x32xf32>
    %154 = vector.broadcast %134 : vector<1x32xf32> to vector<16x32xf32>
    %155 = arith.mulf %153, %154 : vector<16x32xf32>
    %156 = vector.broadcast %135 : vector<1x32xf32> to vector<16x32xf32>
    %157 = arith.addf %155, %156 : vector<16x32xf32>
    %158 = arith.truncf %157 : vector<16x32xf32> to vector<16x32xbf16>
    %c160 = arith.constant 160 : index
    %c0_51 = arith.constant 0 : index
    %159 = vector.load %arg2[%c160, %c0_51] : memref<384x128xbf16, #tpu.memory_space<vmem>>, vector<32x96xbf16>
    %cst_52 = arith.constant dense<0.000000e+00> : vector<16x96xf32>
    %160 = tpu.matmul %158, %159, %cst_52 {dimension_numbers = #tpu.dot_dimension_numbers<[1], [0], [0], [1], [0, 0, 1, 1], [], []>} : vector<16x32xbf16>, vector<32x96xbf16>, vector<16x96xf32> -> vector<16x96xf32>
    %c10 = arith.constant 10 : index
    %c0_53 = arith.constant 0 : index
    %161 = vector.load %arg3[%c10, %c0_53] : memref<24x128xf32, #tpu.memory_space<vmem>>, vector<1x96xf32>
    %162 = vector.broadcast %161 : vector<1x96xf32> to vector<16x96xf32>
    %163 = arith.addf %160, %162 : vector<16x96xf32>
    %164 = vector.extract_strided_slice %163 {offsets = [0, 0], sizes = [16, 16], strides = [1, 1]} : vector<16x96xf32> to vector<16x16xf32>
    %165 = arith.truncf %164 : vector<16x16xf32> to vector<16x16xbf16>
    %166 = vector.extract_strided_slice %163 {offsets = [0, 32], sizes = [16, 16], strides = [1, 1]} : vector<16x96xf32> to vector<16x16xf32>
    %167 = arith.truncf %166 : vector<16x16xf32> to vector<16x16xbf16>
    %168 = vector.extract_strided_slice %163 {offsets = [0, 64], sizes = [16, 16], strides = [1, 1]} : vector<16x96xf32> to vector<16x16xf32>
    %169 = arith.truncf %168 : vector<16x16xf32> to vector<16x16xbf16>
    %cst_54 = arith.constant dense<0.000000e+00> : vector<16x16xf32>
    %170 = tpu.matmul %165, %167, %cst_54 {dimension_numbers = #tpu.dot_dimension_numbers<[1], [1], [0], [0], [0, 0, 1, 0], [], []>} : vector<16x16xbf16>, vector<16x16xbf16>, vector<16x16xf32> -> vector<16x16xf32>
    %cst_55 = arith.constant 2.500000e-01 : f32
    %171 = vector.broadcast %cst_55 : f32 to vector<16x16xf32>
    %172 = arith.mulf %170, %171 : vector<16x16xf32>
    %173 = arith.addf %172, %0 : vector<16x16xf32>
    %cst_56 = arith.constant dense<0xFF800000> : vector<16xf32>
    %174 = vector.multi_reduction <maximumf>, %173, %cst_56 [1] : vector<16x16xf32> to vector<16xf32>
    %175 = vector.shape_cast %174 : vector<16xf32> to vector<16x1xf32>
    %176 = vector.broadcast %175 : vector<16x1xf32> to vector<16x16xf32>
    %177 = arith.subf %173, %176 : vector<16x16xf32>
    %178 = math.exp %177 : vector<16x16xf32>
    %cst_57 = arith.constant dense<0.000000e+00> : vector<16xf32>
    %179 = vector.multi_reduction <add>, %178, %cst_57 [1] : vector<16x16xf32> to vector<16xf32>
    %180 = vector.shape_cast %179 : vector<16xf32> to vector<16x1xf32>
    %181 = tpu.reciprocal %180 {approx = true} : vector<16x1xf32> -> vector<16x1xf32>
    %182 = vector.broadcast %181 : vector<16x1xf32> to vector<16x16xf32>
    %183 = arith.mulf %178, %182 : vector<16x16xf32>
    %184 = arith.truncf %183 : vector<16x16xf32> to vector<16x16xbf16>
    %cst_58 = arith.constant dense<0.000000e+00> : vector<16x16xf32>
    %185 = tpu.matmul %184, %169, %cst_58 {dimension_numbers = #tpu.dot_dimension_numbers<[1], [0], [0], [1], [0, 0, 1, 1], [], []>} : vector<16x16xbf16>, vector<16x16xbf16>, vector<16x16xf32> -> vector<16x16xf32>
    %186 = vector.extract_strided_slice %163 {offsets = [0, 16], sizes = [16, 16], strides = [1, 1]} : vector<16x96xf32> to vector<16x16xf32>
    %187 = arith.truncf %186 : vector<16x16xf32> to vector<16x16xbf16>
    %188 = vector.extract_strided_slice %163 {offsets = [0, 48], sizes = [16, 16], strides = [1, 1]} : vector<16x96xf32> to vector<16x16xf32>
    %189 = arith.truncf %188 : vector<16x16xf32> to vector<16x16xbf16>
    %190 = vector.extract_strided_slice %163 {offsets = [0, 80], sizes = [16, 16], strides = [1, 1]} : vector<16x96xf32> to vector<16x16xf32>
    %191 = arith.truncf %190 : vector<16x16xf32> to vector<16x16xbf16>
    %cst_59 = arith.constant dense<0.000000e+00> : vector<16x16xf32>
    %192 = tpu.matmul %187, %189, %cst_59 {dimension_numbers = #tpu.dot_dimension_numbers<[1], [1], [0], [0], [0, 0, 1, 0], [], []>} : vector<16x16xbf16>, vector<16x16xbf16>, vector<16x16xf32> -> vector<16x16xf32>
    %cst_60 = arith.constant 2.500000e-01 : f32
    %193 = vector.broadcast %cst_60 : f32 to vector<16x16xf32>
    %194 = arith.mulf %192, %193 : vector<16x16xf32>
    %195 = arith.addf %194, %0 : vector<16x16xf32>
    %cst_61 = arith.constant dense<0xFF800000> : vector<16xf32>
    %196 = vector.multi_reduction <maximumf>, %195, %cst_61 [1] : vector<16x16xf32> to vector<16xf32>
    %197 = vector.shape_cast %196 : vector<16xf32> to vector<16x1xf32>
    %198 = vector.broadcast %197 : vector<16x1xf32> to vector<16x16xf32>
    %199 = arith.subf %195, %198 : vector<16x16xf32>
    %200 = math.exp %199 : vector<16x16xf32>
    %cst_62 = arith.constant dense<0.000000e+00> : vector<16xf32>
    %201 = vector.multi_reduction <add>, %200, %cst_62 [1] : vector<16x16xf32> to vector<16xf32>
    %202 = vector.shape_cast %201 : vector<16xf32> to vector<16x1xf32>
    %203 = tpu.reciprocal %202 {approx = true} : vector<16x1xf32> -> vector<16x1xf32>
    %204 = vector.broadcast %203 : vector<16x1xf32> to vector<16x16xf32>
    %205 = arith.mulf %200, %204 : vector<16x16xf32>
    %206 = arith.truncf %205 : vector<16x16xf32> to vector<16x16xbf16>
    %cst_63 = arith.constant dense<0.000000e+00> : vector<16x16xf32>
    %207 = tpu.matmul %206, %191, %cst_63 {dimension_numbers = #tpu.dot_dimension_numbers<[1], [0], [0], [1], [0, 0, 1, 1], [], []>} : vector<16x16xbf16>, vector<16x16xbf16>, vector<16x16xf32> -> vector<16x16xf32>
    %208 = tpu.concatenate %185, %207 in 1 : vector<16x16xf32>, vector<16x16xf32> -> vector<16x32xf32>
    %209 = arith.truncf %208 : vector<16x32xf32> to vector<16x32xbf16>
    %c192 = arith.constant 192 : index
    %c0_64 = arith.constant 0 : index
    %210 = vector.load %arg2[%c192, %c0_64] : memref<384x128xbf16, #tpu.memory_space<vmem>>, vector<32x32xbf16>
    %cst_65 = arith.constant dense<0.000000e+00> : vector<16x32xf32>
    %211 = tpu.matmul %209, %210, %cst_65 {dimension_numbers = #tpu.dot_dimension_numbers<[1], [0], [0], [1], [0, 0, 1, 1], [], []>} : vector<16x32xbf16>, vector<32x32xbf16>, vector<16x32xf32> -> vector<16x32xf32>
    %c11 = arith.constant 11 : index
    %c0_66 = arith.constant 0 : index
    %212 = vector.load %arg3[%c11, %c0_66] : memref<24x128xf32, #tpu.memory_space<vmem>>, vector<1x32xf32>
    %213 = vector.broadcast %212 : vector<1x32xf32> to vector<16x32xf32>
    %214 = arith.addf %211, %213 : vector<16x32xf32>
    %215 = arith.addf %157, %214 : vector<16x32xf32>
    %c12 = arith.constant 12 : index
    %c0_67 = arith.constant 0 : index
    %216 = vector.load %arg3[%c12, %c0_67] : memref<24x128xf32, #tpu.memory_space<vmem>>, vector<1x32xf32>
    %c13 = arith.constant 13 : index
    %c0_68 = arith.constant 0 : index
    %217 = vector.load %arg3[%c13, %c0_68] : memref<24x128xf32, #tpu.memory_space<vmem>>, vector<1x32xf32>
    %cst_69 = arith.constant dense<0.000000e+00> : vector<16xf32>
    %218 = vector.multi_reduction <add>, %215, %cst_69 [1] : vector<16x32xf32> to vector<16xf32>
    %219 = vector.shape_cast %218 : vector<16xf32> to vector<16x1xf32>
    %cst_70 = arith.constant 3.200000e+01 : f32
    %220 = vector.broadcast %cst_70 : f32 to vector<16x1xf32>
    %221 = arith.divf %219, %220 : vector<16x1xf32>
    %222 = vector.broadcast %221 : vector<16x1xf32> to vector<16x32xf32>
    %223 = arith.subf %215, %222 : vector<16x32xf32>
    %224 = arith.mulf %223, %223 : vector<16x32xf32>
    %cst_71 = arith.constant dense<0.000000e+00> : vector<16xf32>
    %225 = vector.multi_reduction <add>, %224, %cst_71 [1] : vector<16x32xf32> to vector<16xf32>
    %226 = vector.shape_cast %225 : vector<16xf32> to vector<16x1xf32>
    %cst_72 = arith.constant 3.200000e+01 : f32
    %227 = vector.broadcast %cst_72 : f32 to vector<16x1xf32>
    %228 = arith.divf %226, %227 : vector<16x1xf32>
    %cst_73 = arith.constant 9.99999996E-13 : f32
    %229 = vector.broadcast %cst_73 : f32 to vector<16x1xf32>
    %230 = arith.addf %228, %229 : vector<16x1xf32>
    %231 = math.rsqrt %230 : vector<16x1xf32>
    %232 = vector.broadcast %221 : vector<16x1xf32> to vector<16x32xf32>
    %233 = arith.subf %215, %232 : vector<16x32xf32>
    %234 = vector.broadcast %231 : vector<16x1xf32> to vector<16x32xf32>
    %235 = arith.mulf %233, %234 : vector<16x32xf32>
    %236 = vector.broadcast %216 : vector<1x32xf32> to vector<16x32xf32>
    %237 = arith.mulf %235, %236 : vector<16x32xf32>
    %238 = vector.broadcast %217 : vector<1x32xf32> to vector<16x32xf32>
    %239 = arith.addf %237, %238 : vector<16x32xf32>
    %240 = arith.truncf %239 : vector<16x32xf32> to vector<16x32xbf16>
    %c224 = arith.constant 224 : index
    %c0_74 = arith.constant 0 : index
    %241 = vector.load %arg2[%c224, %c0_74] : memref<384x128xbf16, #tpu.memory_space<vmem>>, vector<32x64xbf16>
    %cst_75 = arith.constant dense<0.000000e+00> : vector<16x64xf32>
    %242 = tpu.matmul %240, %241, %cst_75 {dimension_numbers = #tpu.dot_dimension_numbers<[1], [0], [0], [1], [0, 0, 1, 1], [], []>} : vector<16x32xbf16>, vector<32x64xbf16>, vector<16x64xf32> -> vector<16x64xf32>
    %c14 = arith.constant 14 : index
    %c0_76 = arith.constant 0 : index
    %243 = vector.load %arg3[%c14, %c0_76] : memref<24x128xf32, #tpu.memory_space<vmem>>, vector<1x64xf32>
    %244 = vector.broadcast %243 : vector<1x64xf32> to vector<16x64xf32>
    %245 = arith.addf %242, %244 : vector<16x64xf32>
    %cst_77 = arith.constant 5.000000e-01 : f32
    %246 = vector.broadcast %cst_77 : f32 to vector<16x64xf32>
    %247 = arith.mulf %246, %245 : vector<16x64xf32>
    %cst_78 = arith.constant 4.471500e-02 : f32
    %248 = vector.broadcast %cst_78 : f32 to vector<16x64xf32>
    %249 = arith.mulf %248, %245 : vector<16x64xf32>
    %250 = arith.mulf %249, %245 : vector<16x64xf32>
    %251 = arith.mulf %250, %245 : vector<16x64xf32>
    %252 = arith.addf %245, %251 : vector<16x64xf32>
    %cst_79 = arith.constant 0.797884583 : f32
    %253 = vector.broadcast %cst_79 : f32 to vector<16x64xf32>
    %254 = arith.mulf %253, %252 : vector<16x64xf32>
    %255 = math.tanh %254 : vector<16x64xf32>
    %cst_80 = arith.constant 1.000000e+00 : f32
    %256 = vector.broadcast %cst_80 : f32 to vector<16x64xf32>
    %257 = arith.addf %256, %255 : vector<16x64xf32>
    %258 = arith.mulf %247, %257 : vector<16x64xf32>
    %259 = arith.truncf %258 : vector<16x64xf32> to vector<16x64xbf16>
    %c256 = arith.constant 256 : index
    %c0_81 = arith.constant 0 : index
    %260 = vector.load %arg2[%c256, %c0_81] : memref<384x128xbf16, #tpu.memory_space<vmem>>, vector<64x32xbf16>
    %cst_82 = arith.constant dense<0.000000e+00> : vector<16x32xf32>
    %261 = tpu.matmul %259, %260, %cst_82 {dimension_numbers = #tpu.dot_dimension_numbers<[1], [0], [0], [1], [0, 0, 1, 1], [], []>} : vector<16x64xbf16>, vector<64x32xbf16>, vector<16x32xf32> -> vector<16x32xf32>
    %c15 = arith.constant 15 : index
    %c0_83 = arith.constant 0 : index
    %262 = vector.load %arg3[%c15, %c0_83] : memref<24x128xf32, #tpu.memory_space<vmem>>, vector<1x32xf32>
    %263 = vector.broadcast %262 : vector<1x32xf32> to vector<16x32xf32>
    %264 = arith.addf %261, %263 : vector<16x32xf32>
    %265 = arith.addf %239, %264 : vector<16x32xf32>
    %c16 = arith.constant 16 : index
    %c0_84 = arith.constant 0 : index
    %266 = vector.load %arg3[%c16, %c0_84] : memref<24x128xf32, #tpu.memory_space<vmem>>, vector<1x32xf32>
    %c17 = arith.constant 17 : index
    %c0_85 = arith.constant 0 : index
    %267 = vector.load %arg3[%c17, %c0_85] : memref<24x128xf32, #tpu.memory_space<vmem>>, vector<1x32xf32>
    %cst_86 = arith.constant dense<0.000000e+00> : vector<16xf32>
    %268 = vector.multi_reduction <add>, %265, %cst_86 [1] : vector<16x32xf32> to vector<16xf32>
    %269 = vector.shape_cast %268 : vector<16xf32> to vector<16x1xf32>
    %cst_87 = arith.constant 3.200000e+01 : f32
    %270 = vector.broadcast %cst_87 : f32 to vector<16x1xf32>
    %271 = arith.divf %269, %270 : vector<16x1xf32>
    %272 = vector.broadcast %271 : vector<16x1xf32> to vector<16x32xf32>
    %273 = arith.subf %265, %272 : vector<16x32xf32>
    %274 = arith.mulf %273, %273 : vector<16x32xf32>
    %cst_88 = arith.constant dense<0.000000e+00> : vector<16xf32>
    %275 = vector.multi_reduction <add>, %274, %cst_88 [1] : vector<16x32xf32> to vector<16xf32>
    %276 = vector.shape_cast %275 : vector<16xf32> to vector<16x1xf32>
    %cst_89 = arith.constant 3.200000e+01 : f32
    %277 = vector.broadcast %cst_89 : f32 to vector<16x1xf32>
    %278 = arith.divf %276, %277 : vector<16x1xf32>
    %cst_90 = arith.constant 9.99999996E-13 : f32
    %279 = vector.broadcast %cst_90 : f32 to vector<16x1xf32>
    %280 = arith.addf %278, %279 : vector<16x1xf32>
    %281 = math.rsqrt %280 : vector<16x1xf32>
    %282 = vector.broadcast %271 : vector<16x1xf32> to vector<16x32xf32>
    %283 = arith.subf %265, %282 : vector<16x32xf32>
    %284 = vector.broadcast %281 : vector<16x1xf32> to vector<16x32xf32>
    %285 = arith.mulf %283, %284 : vector<16x32xf32>
    %286 = vector.broadcast %266 : vector<1x32xf32> to vector<16x32xf32>
    %287 = arith.mulf %285, %286 : vector<16x32xf32>
    %288 = vector.broadcast %267 : vector<1x32xf32> to vector<16x32xf32>
    %289 = arith.addf %287, %288 : vector<16x32xf32>
    %290 = vector.extract_strided_slice %289 {offsets = [0, 0], sizes = [1, 32], strides = [1, 1]} : vector<16x32xf32> to vector<1x32xf32>
    %291 = vector.extract_strided_slice %289 {offsets = [8, 0], sizes = [1, 32], strides = [1, 1]} : vector<16x32xf32> to vector<1x32xf32>
    %292 = tpu.concatenate %290, %291 in 0 : vector<1x32xf32>, vector<1x32xf32> -> vector<2x32xf32>
    %293 = arith.truncf %292 : vector<2x32xf32> to vector<2x32xbf16>
    %c320 = arith.constant 320 : index
    %c0_91 = arith.constant 0 : index
    %294 = vector.load %arg2[%c320, %c0_91] : memref<384x128xbf16, #tpu.memory_space<vmem>>, vector<32x32xbf16>
    %cst_92 = arith.constant dense<0.000000e+00> : vector<2x32xf32>
    %295 = tpu.matmul %293, %294, %cst_92 {dimension_numbers = #tpu.dot_dimension_numbers<[1], [0], [0], [1], [0, 0, 1, 1], [], []>} : vector<2x32xbf16>, vector<32x32xbf16>, vector<2x32xf32> -> vector<2x32xf32>
    %c18 = arith.constant 18 : index
    %c0_93 = arith.constant 0 : index
    %296 = vector.load %arg3[%c18, %c0_93] : memref<24x128xf32, #tpu.memory_space<vmem>>, vector<1x32xf32>
    %297 = vector.broadcast %296 : vector<1x32xf32> to vector<2x32xf32>
    %298 = arith.addf %295, %297 : vector<2x32xf32>
    %299 = math.tanh %298 : vector<2x32xf32>
    %300 = arith.truncf %299 : vector<2x32xf32> to vector<2x32xbf16>
    %c352 = arith.constant 352 : index
    %c0_94 = arith.constant 0 : index
    %301 = vector.load %arg2[%c352, %c0_94] : memref<384x128xbf16, #tpu.memory_space<vmem>>, vector<32x5xbf16>
    %cst_95 = arith.constant dense<0.000000e+00> : vector<2x5xf32>
    %302 = tpu.matmul %300, %301, %cst_95 {dimension_numbers = #tpu.dot_dimension_numbers<[1], [0], [0], [1], [0, 0, 1, 1], [], []>} : vector<2x32xbf16>, vector<32x5xbf16>, vector<2x5xf32> -> vector<2x5xf32>
    %c19 = arith.constant 19 : index
    %c0_96 = arith.constant 0 : index
    %303 = vector.load %arg3[%c19, %c0_96] : memref<24x128xf32, #tpu.memory_space<vmem>>, vector<1x5xf32>
    %304 = vector.broadcast %303 : vector<1x5xf32> to vector<2x5xf32>
    %305 = arith.addf %302, %304 : vector<2x5xf32>
    %cst_97 = arith.constant 0.000000e+00 : f32
    %306 = vector.broadcast %cst_97 : f32 to vector<2x91xf32>
    %307 = tpu.concatenate %299, %305, %306 in 1 : vector<2x32xf32>, vector<2x5xf32>, vector<2x91xf32> -> vector<2x128xf32>
    %c0_98 = arith.constant 0 : index
    %c0_99 = arith.constant 0 : index
    %308 = vector.load %arg4[%c0_98, %c0_99] : memref<2x128xf32, #tpu.memory_space<vmem>>, vector<2x128xf32>
    tpu.vector_store %arg4[%c0_98, %c0_99], %307 {strides = array<i32>} : memref<2x128xf32, #tpu.memory_space<vmem>>, vector<2x128xf32>,
    return
  }
}

</mosaic_0001>

<bundles_post_ra>
// kernel: basic_bert_forward.1
= control target key start
LH: loop header
LB: loop body
LE: loop exit
PB: predicated region body
PF: predicated region fallthrough
CT: control target
= control target key end

     0   :  { %vm24_vm0 = vcmask 261120   ;;  %v1851_v15 = vmov 0.0   ;;  %vm1852_vm1 = vmmov 0   ;;  %s1853_s28 = smov 80   ;;  %s1854_s29 = smov 96   ;;  %vm134_vm2 = vcmask 130048   ;;  %s2219_s0 = inlined_call_operand.vmem [shape: f32[16,32], index: 0, kind: input, shape index: {}]   ;;  %s2220_s2 = inlined_call_operand.vmem [shape: bf16[384,128], index: 2, kind: input, shape index: {}]   ;;  %s2221_s3 = inlined_call_operand.vmem [shape: f32[24,128], index: 3, kind: input, shape index: {}]   ;;  %s2222_s1 = inlined_call_operand.vmem [shape: f32[16,16], index: 1, kind: input, shape index: {}]   ;;  %s2223_s4 = inlined_call_operand.vmem [shape: f32[2,128], index: 4, kind: output, shape index: {}]  }
   0x1   :  { %v20_v0 = vld [vmem:[%s2219_s0] sm:$0xff]  ;;  %v21_v1 = vld [vmem:[%s2219_s0 + $0x8] sm:$0xff]  ;;  %1610 = vmatprep.subr.bf16.mxu0 %v1851_v15  ;;  %1618 = vmatprep.subr.bf16.mxu1 %v1851_v15  ;;  %s1855_s30 = smov 112   ;;  %s1857_s9 = smov 48   ;;  %vm621_vm3 = vcmask 523264   ;;  %vm1353_vm4 = vcmask 1040384  }
   0x2   :  { %v25_v2 = vsel %vm24_vm0, %v20_v0, 0.0  ;;  %v28_v3 = vsel %vm24_vm0, %v21_v1, 0.0  ;;  %v1765_v14 = vld [vmem:[%s2220_s2] sm:$0xff]   ;;  %v1766_v16 = vld [vmem:[%s2220_s2 + $0x8] sm:$0xff]   ;;  %1614 = vmatprep.mubr.msk.bf16.mxu0 %vm1852_vm1, %v1851_v15  ;;  %1620 = vmatprep.mubr.msk.bf16.mxu1 %vm1852_vm1, %v1851_v15  ;;  %s1858_s14 = smov 16   ;;  %vm1491_vm5 = vcmask 302080  }
   0x3   :  { %26 = vadd.xlane.f32.xlu0 %v25_v2  ;;  %1611 = vmatpush3.bf16.msra.mxu0 %v1765_v14  ;;  %v1498_v25 = vld [vmem:[%s2221_s3] ss:$0 sm:$0xff]  ;;  %v1499_v29 = vld [vmem:[%s2221_s3 + $0x1] ss:$0 sm:$0xff]  ;;  %v1500_v34 = vld [vmem:[%s2221_s3 + $0x2] ss:$0 sm:$0xff] }
   0x4   :  { %1612 = vmatprep.subr.bf16.mxu0 %v1851_v15  ;;  %v1949_v48 = vld [vmem:[%s2222_s1] sm:$0xff]  ;;  %v1954_v52 = vld [vmem:[%s2222_s1 + $0x8] sm:$0xff]  ;;  %s1856_s1 = smov 64  }
   0x7   :  { %29 = vadd.xlane.f32.xlu0 %v28_v3  ;;  %1613 = vmatpush3.bf16.msra.mxu0 %v1766_v16 }
   0x8   :  { %1624 = vmatprep.subr.bf16.mxu0 %v1851_v15 }
  0x90   :  { %v27_v4 = vpop.xlane.xlu0 %26 }
  0x91   :  { %v32_v5 = vmul.f32 0.03125, %v27_v4 }
  0x93   :  { %v34_v6 = vsub.f32 %v20_v0, %v32_v5 }
  0x94   :  { %v30_v7 = vpop.xlane.xlu0 %29 }
  0x95   :  { %v33_v8 = vmul.f32 0.03125, %v30_v7  ;;  %v36_v9 = vmul.f32 %v34_v6, %v34_v6 }
  0x97   :  { %v35_v10 = vsub.f32 %v21_v1, %v33_v8  ;;  %v38_v11 = vsel %vm24_vm0, %v36_v9, 0.0 }
  0x98   :  { %39 = vadd.xlane.f32.xlu1 %v38_v11 }
  0x99   :  { %v37_v12 = vmul.f32 %v35_v10, %v35_v10 }
  0x9b   :  { %v41_v13 = vsel %vm24_vm0, %v37_v12, 0.0 }
  0x9c   :  { %42 = vadd.xlane.f32.xlu1 %v41_v13 }
 0x125   :  { %v40_v17 = vpop.xlane.xlu1 %39 }
 0x126   :  { %v44_v18 = vmul.f32 0.03125, %v40_v17 }
 0x128   :  { %v46_v19 = vadd.f32 1e-12, %v44_v18 }
 0x129   :  { %v43_v20 = vpop.xlane.xlu1 %42 }
 0x12a   :  { %1789 = vrsqrt.f32 %v46_v19  ;;  %v45_v21 = vmul.f32 0.03125, %v43_v20 }
 0x12c   :  { %v47_v22 = vadd.f32 1e-12, %v45_v21 }
 0x12e   :  { %1791 = vrsqrt.f32 %v47_v22 }
 0x134   :  { %v1790_v23 = vpop.eup %1789 }
 0x135   :  { %v50_v24 = vmul.f32 %v1790_v23, %v34_v6 }
 0x137   :  { %v56_v28 = vmul.f32 %v1498_v25, %v50_v24 }
 0x138   :  { %v1792_v26 = vpop.eup %1791 }
 0x139   :  { %v51_v27 = vmul.f32 %v1792_v26, %v35_v10  ;;  %v1915_v31 = vadd.f32 %v1499_v29, %v56_v28 }
 0x13b   :  { %v57_v30 = vmul.f32 %v1498_v25, %v51_v27 }
 0x13d   :  { %v1917_v32 = vadd.f32 %v1499_v29, %v57_v30 }
 0x13f   :  { %v64_v33 = vpack.c.bf16 %v1917_v32, %v1915_v31 }
 0x141   :  { %1615 = vmatmul.mubr.msk.bf16.vlgmr.msra.gmra.mrb[0].mxu0 %vm24_vm0, %v64_v33 }
 0x142   :  { %1626 = vmatprep.mubr.msk.bf16.mxu0 %vm1852_vm1, %v1851_v15 }
 0x214   :  { %v123_v35 = vpop.f32.mrb[0].mxu0 }
 0x215   :  { %v1616_v36 = vpop.f32.mrb[1].mxu0  ;;  %v124_v38 = vadd.f32 %v1500_v34, %v123_v35 }
 0x216   :  { %v126_v37 = vpop.f32.mrb[2].mxu0 }
 0x217   :  { %v127_v39 = vadd.f32 %v1500_v34, %v126_v37  ;;  %v1617_v40 = vpop.f32.mrb[3].mxu0 }
 0x219   :  { %v1927_v41 = vpack.c.bf16 %v127_v39, %v124_v38 }
 0x21b   :  { %258 = vrot.lane.b32.xlu1 %v1927_v41, %s1853_s28  ;;  %132 = vrot.lane.b32.xlu0 %v1927_v41, %s1854_s29 }
 0x21f   :  { %256 = vrot.lane.b32.xlu1 %v1927_v41, %s1855_s30 }
 0x28d   :  { %v133_v42 = vpop.permute.xlu0 %132  ;;  %v259_v44 = vpop.permute.xlu1 %258 }
 0x28e   :  { %v139_v43 = vsel %vm134_vm2, %v133_v42, 0  ;;  %v264_v45 = vsel %vm134_vm2, %v259_v44, 0  ;;  %v1767_v44 = vld [vmem:[%s2220_s2 + $0x10] sm:$0xff]  }
 0x28f   :  { %1619 = vmatpush3.bf16.xpose.msra.mxu1 %v139_v43 }
 0x290   :  { %1630 = vmatprep.subr.bf16.mxu1 %v1851_v15 }
 0x291   :  { %v257_v46 = vpop.permute.xlu1 %256 }
 0x296   :  { %1621 = vmatmul.mubr.msk.bf16.vlgmr.msra.gmra.mrb[0].mxu1 %vm134_vm2, %v1927_v41 }
 0x297   :  { %1631 = vmatpush3.bf16.xpose.msra.mxu1 %v264_v45  ;;  %1632 = vmatprep.mubr.msk.bf16.mxu1 %vm1852_vm1, %v1851_v15 }
 0x298   :  { %1642 = vmatprep.subr.bf16.mxu1 %v1851_v15 }
 0x29e   :  { %1633 = vmatmul.mubr.msk.bf16.vlgmr.msra.gmra.mrb[4].mxu1 %vm134_vm2, %v257_v46 }
 0x29f   :  { %1646 = vmatprep.mubr.msk.bf16.mxu1 %vm1852_vm1, %v1851_v15  ;;  %1643 = vmatpush3.bf16.msra.mxu1 %v1767_v44  ;;  %v1514_v44 = vld [vmem:[%s2221_s3 + $0x6] ss:$0 sm:$0xff] }
 0x2a0   :  { %1644 = vmatprep.subr.bf16.mxu1 %v1851_v15 }
 0x369   :  { %v175_v47 = vpop.f32.mrb[0].mxu1 }
 0x36a   :  { %v182_v49 = vmul.f32 0.25, %v175_v47  ;;  %v1622_v50 = vpop.f32.mrb[1].mxu1 }
 0x36b   :  { %v178_v51 = vpop.f32.mrb[2].mxu1  ;;  %v1768_v50 = vld [vmem:[%s2220_s2 + $0x18] sm:$0xff]  }
 0x36c   :  { %v183_v53 = vmul.f32 0.25, %v178_v51  ;;  %v1623_v54 = vpop.f32.mrb[3].mxu1  ;;  %v184_v55 = vadd.f32 %v182_v49, %v1949_v48  ;;  %1645 = vmatpush3.bf16.msra.mxu1 %v1768_v50 }
 0x36d   :  { %1658 = vmatprep.subr.bf16.mxu1 %v1851_v15 }
 0x36e   :  { %v186_v56 = vsel %vm134_vm2, %v184_v55, -inf  ;;  %v185_v57 = vadd.f32 %v183_v53, %v1954_v52 }
 0x36f   :  { %187 = vmax.xlane.f32.xlu1 %v186_v56 }
 0x370   :  { %v189_v58 = vsel %vm134_vm2, %v185_v57, -inf }
 0x371   :  { %190 = vmax.xlane.f32.xlu0 %v189_v58  ;;  %v300_v59 = vpop.f32.mrb[4].mxu1 }
 0x372   :  { %v307_v60 = vmul.f32 0.25, %v300_v59  ;;  %v1634_v61 = vpop.f32.mrb[5].mxu1 }
 0x373   :  { %v303_v62 = vpop.f32.mrb[6].mxu1 }
 0x374   :  { %v308_v63 = vmul.f32 0.25, %v303_v62  ;;  %v1635_v0 = vpop.f32.mrb[7].mxu1  ;;  %v309_v1 = vadd.f32 %v307_v60, %v1949_v48 }
 0x376   :  { %v311_v2 = vsel %vm134_vm2, %v309_v1, -inf  ;;  %v310_v3 = vadd.f32 %v308_v63, %v1954_v52  ;;  %v1508_v63 = vld [vmem:[%s2221_s3 + $0x3] ss:$0 sm:$0xff] }
 0x377   :  { %312 = vmax.xlane.f32.xlu0 %v311_v2 }
 0x378   :  { %v314_v4 = vsel %vm134_vm2, %v310_v3, -inf }
 0x37b   :  { %315 = vmax.xlane.f32.xlu0 %v314_v4 }
 0x3fc   :  { %v188_v5 = vpop.xlane.xlu1 %187 }
 0x3fd   :  { %v192_v6 = vsub.f32 %v184_v55, %v188_v5 }
 0x3fe   :  { %v191_v7 = vpop.xlane.xlu0 %190 }
 0x3ff   :  { %v194_v8 = vmul.f32 1.442695, %v192_v6  ;;  %v193_v9 = vsub.f32 %v185_v57, %v191_v7 }
 0x401   :  { %1793 = vpow2.f32 %v194_v8  ;;  %v196_v10 = vmul.f32 1.442695, %v193_v9 }
 0x403   :  { %1795 = vpow2.f32 %v196_v10 }
 0x404   :  { %v313_v11 = vpop.xlane.xlu0 %312 }
 0x405   :  { %v317_v12 = vsub.f32 %v309_v1, %v313_v11 }
 0x407   :  { %v319_v13 = vmul.f32 1.442695, %v317_v12 }
 0x408   :  { %v316_v14 = vpop.xlane.xlu0 %315 }
 0x409   :  { %1797 = vpow2.f32 %v319_v13  ;;  %v318_v16 = vsub.f32 %v310_v3, %v316_v14 }
 0x40b   :  { %v1794_v17 = vpop.eup %1793  ;;  %v321_v18 = vmul.f32 1.442695, %v318_v16 }
 0x40c   :  { %v198_v19 = vsel %vm134_vm2, %v1794_v17, 0.0 }
 0x40d   :  { %v1796_v20 = vpop.eup %1795  ;;  %1799 = vpow2.f32 %v321_v18  ;;  %199 = vadd.xlane.f32.xlu1 %v198_v19 }
 0x40e   :  { %v201_v21 = vsel %vm134_vm2, %v1796_v20, 0.0 }
 0x40f   :  { %202 = vadd.xlane.f32.xlu0 %v201_v21 }
 0x413   :  { %v1798_v22 = vpop.eup %1797 }
 0x414   :  { %v323_v23 = vsel %vm134_vm2, %v1798_v22, 0.0 }
 0x415   :  { %324 = vadd.xlane.f32.xlu1 %v323_v23 }
 0x417   :  { %v1800_v24 = vpop.eup %1799 }
 0x418   :  { %v326_v25 = vsel %vm134_vm2, %v1800_v24, 0.0 }
 0x419   :  { %327 = vadd.xlane.f32.xlu0 %v326_v25 }
 0x426   :  { %209 = vrot.lane.b32.xlu1 %v1927_v41, %s1856_s1 }
 0x42f   :  { %334 = vrot.lane.b32.xlu0 %v1927_v41, %s1857_s9 }
 0x49a   :  { %v200_v26 = vpop.xlane.xlu1 %199 }
 0x49b   :  { %1801 = vrcp.f32 %v200_v26 }
 0x49c   :  { %v203_v27 = vpop.xlane.xlu0 %202 }
 0x49d   :  { %1803 = vrcp.f32 %v203_v27 }
 0x4a2   :  { %v325_v28 = vpop.xlane.xlu1 %324 }
 0x4a3   :  { %1805 = vrcp.f32 %v325_v28  ;;  %v1512_v28 = vld [vmem:[%s2221_s3 + $0x4] ss:$0 sm:$0xff] }
 0x4a5   :  { %v1802_v29 = vpop.eup %1801 }
 0x4a6   :  { %v210_v30 = vpop.permute.xlu1 %209  ;;  %v328_v33 = vpop.xlane.xlu0 %327  ;;  %v206_v35 = vmul.f32 %v1802_v29, %v1794_v17 }
 0x4a7   :  { %v1804_v34 = vpop.eup %1803  ;;  %1807 = vrcp.f32 %v328_v33  ;;  %1625 = vmatpush3.bf16.msra.mxu0 %v210_v30 }
 0x4a8   :  { %v207_v36 = vmul.f32 %v1804_v34, %v1796_v20  ;;  %1636 = vmatprep.subr.bf16.mxu0 %v1851_v15  ;;  %v1770_v20 = vld [vmem:[%s2220_s2 + $0x28] sm:$0xff]  }
 0x4aa   :  { %v335_v37 = vpop.permute.xlu0 %334  ;;  %v208_v38 = vpack.c.bf16 %v207_v36, %v206_v35  ;;  %v1513_v35 = vld [vmem:[%s2221_s3 + $0x5] ss:$0 sm:$0xff] }
 0x4ac   :  { %1627 = vmatmul.mubr.msk.bf16.vlgmr.msra.gmra.mrb[4].mxu0 %vm134_vm2, %v208_v38 }
 0x4ad   :  { %1637 = vmatpush3.bf16.msra.mxu0 %v335_v37  ;;  %1638 = vmatprep.mubr.msk.bf16.mxu0 %vm1852_vm1, %v1851_v15  ;;  %v1806_v39 = vpop.eup %1805 }
 0x4ae   :  { %1650 = vmatprep.subr.bf16.mxu0 %v1851_v15  ;;  %v331_v41 = vmul.f32 %v1806_v39, %v1798_v22 }
 0x4b1   :  { %v1808_v40 = vpop.eup %1807 }
 0x4b2   :  { %v332_v42 = vmul.f32 %v1808_v40, %v1800_v24  ;;  %v1771_v40 = vld [vmem:[%s2220_s2 + $0x30] sm:$0xff]  }
 0x4b4   :  { %v333_v43 = vpack.c.bf16 %v332_v42, %v331_v41  ;;  %v1772_v41 = vld [vmem:[%s2220_s2 + $0x38] sm:$0xff]   ;;  %v1773_v42 = vld [vmem:[%s2220_s2 + $0x40] sm:$0xff]  }
 0x4b6   :  { %1639 = vmatmul.mubr.msk.bf16.vlgmr.msra.gmra.mrb[8].mxu0 %vm134_vm2, %v333_v43  ;;  %v1774_v43 = vld [vmem:[%s2220_s2 + $0x48] sm:$0xff]  }
 0x4b7   :  { %1654 = vmatprep.mubr.msk.bf16.mxu0 %vm1852_vm1, %v1851_v15 }
 0x57f   :  { %v249_v45 = vpop.f32.mrb[4].mxu0 }
 0x580   :  { %v1628_v46 = vpop.f32.mrb[5].mxu0 }
 0x581   :  { %v252_v47 = vpop.f32.mrb[6].mxu0 }
 0x582   :  { %v1629_v49 = vpop.f32.mrb[7].mxu0 }
 0x589   :  { %v374_v51 = vpop.f32.mrb[8].mxu0 }
 0x58a   :  { %v1640_v53 = vpop.f32.mrb[9].mxu0 }
 0x58b   :  { %v377_v54 = vpop.f32.mrb[10].mxu0 }
 0x58c   :  { %v1755_v55 = vpack.i.bf16 %v377_v54, %v374_v51  ;;  %v1641_v56 = vpop.f32.mrb[11].mxu0 }
 0x58e   :  { %1756 = vrot.lane.b32.xlu1 %v1755_v55, %s1858_s14 }
 0x600   :  { %v1757_v57 = vpop.permute.xlu1 %1756 }
 0x601   :  { %v1759_v58 = vunpack.i.h.bf16 %v1757_v57  ;;  %v1758_v59 = vunpack.i.l.bf16 %v1757_v57 }
 0x603   :  { %v390_v60 = vsel %vm134_vm2, %v252_v47, %v1759_v58  ;;  %v389_v61 = vsel %vm134_vm2, %v249_v45, %v1758_v59 }
 0x604   :  { %v391_v62 = vpack.c.bf16 %v390_v60, %v389_v61 }
 0x606   :  { %1647 = vmatmul.mubr.msk.bf16.vlgmr.msra.gmra.mrb[8].mxu1 %vm24_vm0, %v391_v62 }
 0x607   :  { %1666 = vmatprep.mubr.msk.bf16.mxu1 %vm1852_vm1, %v1851_v15  ;;  %1659 = vmatpush3.bf16.msra.mxu1 %v1771_v40 }
 0x608   :  { %1660 = vmatprep.subr.bf16.mxu1 %v1851_v15 }
 0x60b   :  { %1661 = vmatpush3.bf16.msra.mxu1 %v1772_v41 }
 0x60c   :  { %1662 = vmatprep.subr.bf16.mxu1 %v1851_v15 }
 0x60f   :  { %1663 = vmatpush3.bf16.msra.mxu1 %v1773_v42 }
 0x610   :  { %1664 = vmatprep.subr.bf16.mxu1 %v1851_v15 }
 0x613   :  { %1665 = vmatpush3.bf16.msra.mxu1 %v1774_v43 }
 0x614   :  { %1684 = vmatprep.subr.bf16.mxu1 %v1851_v15 }
 0x6d9   :  { %v450_v0 = vpop.f32.mrb[8].mxu1 }
 0x6da   :  { %v451_v1 = vadd.f32 %v1508_v63, %v450_v0  ;;  %v1648_v2 = vpop.f32.mrb[9].mxu1 }
 0x6db   :  { %v453_v3 = vpop.f32.mrb[10].mxu1 }
 0x6dc   :  { %v454_v4 = vadd.f32 %v1508_v63, %v453_v3  ;;  %v1649_v5 = vpop.f32.mrb[11].mxu1  ;;  %v457_v6 = vadd.f32 %v451_v1, %v1915_v31 }
 0x6de   :  { %v461_v7 = vsel %vm24_vm0, %v457_v6, 0.0  ;;  %v458_v8 = vadd.f32 %v454_v4, %v1917_v32  ;;  %v1769_v32 = vld [vmem:[%s2220_s2 + $0x20] sm:$0xff]  }
 0x6df   :  { %462 = vadd.xlane.f32.xlu1 %v461_v7  ;;  %1651 = vmatpush3.bf16.msra.mxu0 %v1769_v32 }
 0x6e0   :  { %v464_v9 = vsel %vm24_vm0, %v458_v8, 0.0  ;;  %1652 = vmatprep.subr.bf16.mxu0 %v1851_v15 }
 0x6e1   :  { %465 = vadd.xlane.f32.xlu0 %v464_v9 }
 0x6e3   :  { %1653 = vmatpush3.bf16.msra.mxu0 %v1770_v20 }
 0x6e4   :  { %1670 = vmatprep.subr.bf16.mxu0 %v1851_v15 }
 0x76c   :  { %v463_v10 = vpop.xlane.xlu1 %462 }
 0x76d   :  { %v467_v11 = vmul.f32 0.03125, %v463_v10 }
 0x76e   :  { %v466_v12 = vpop.xlane.xlu0 %465 }
 0x76f   :  { %v469_v13 = vsub.f32 %v457_v6, %v467_v11  ;;  %v468_v14 = vmul.f32 0.03125, %v466_v12 }
 0x771   :  { %v470_v16 = vsub.f32 %v458_v8, %v468_v14  ;;  %v471_v17 = vmul.f32 %v469_v13, %v469_v13  ;;  %v1518_v8 = vld [vmem:[%s2221_s3 + $0x7] ss:$0 sm:$0xff] }
 0x773   :  { %v473_v18 = vsel %vm24_vm0, %v471_v17, 0.0  ;;  %v472_v19 = vmul.f32 %v470_v16, %v470_v16 }
 0x774   :  { %474 = vadd.xlane.f32.xlu0 %v473_v18 }
 0x775   :  { %v476_v31 = vsel %vm24_vm0, %v472_v19, 0.0 }
 0x776   :  { %477 = vadd.xlane.f32.xlu1 %v476_v31 }
 0x801   :  { %v475_v21 = vpop.xlane.xlu0 %474 }
 0x802   :  { %v479_v22 = vmul.f32 0.03125, %v475_v21 }
 0x803   :  { %v478_v23 = vpop.xlane.xlu1 %477 }
 0x804   :  { %v481_v24 = vadd.f32 1e-12, %v479_v22  ;;  %v480_v25 = vmul.f32 0.03125, %v478_v23 }
 0x806   :  { %1809 = vrsqrt.f32 %v481_v24  ;;  %v482_v26 = vadd.f32 1e-12, %v480_v25 }
 0x808   :  { %1811 = vrsqrt.f32 %v482_v26 }
 0x810   :  { %v1810_v27 = vpop.eup %1809 }
 0x811   :  { %v485_v29 = vmul.f32 %v1810_v27, %v469_v13 }
 0x812   :  { %v1812_v30 = vpop.eup %1811 }
 0x813   :  { %v491_v33 = vmul.f32 %v1512_v28, %v485_v29  ;;  %v486_v34 = vmul.f32 %v1812_v30, %v470_v16  ;;  %v1776_v29 = vld [vmem:[%s2220_s2 + $0x58] sm:$0xff]  }
 0x815   :  { %v492_v36 = vmul.f32 %v1512_v28, %v486_v34  ;;  %v497_v37 = vadd.f32 %v1513_v35, %v491_v33  ;;  %v1775_v28 = vld [vmem:[%s2220_s2 + $0x50] sm:$0xff]  }
 0x817   :  { %v498_v38 = vadd.f32 %v1513_v35, %v492_v36 }
 0x819   :  { %v499_v39 = vpack.c.bf16 %v498_v38, %v497_v37 }
 0x81b   :  { %1655 = vmatmul.mubr.msk.bf16.vlgmr.msra.gmra.mrb[12].mxu0 %vm24_vm0, %v499_v39  ;;  %v1524_v39 = vld [vmem:[%s2221_s3 + $0x8] ss:$0 sm:$0xff] }
 0x81c   :  { %1674 = vmatprep.mubr.msk.bf16.mxu0 %vm1852_vm1, %v1851_v15  ;;  %1671 = vmatpush3.bf16.msra.mxu0 %v1775_v28 }
 0x81d   :  { %1672 = vmatprep.subr.bf16.mxu0 %v1851_v15 }
 0x820   :  { %1673 = vmatpush3.bf16.msra.mxu0 %v1776_v29 }
 0x821   :  { %1678 = vmatprep.subr.bf16.mxu0 %v1851_v15 }
 0x8ee   :  { %v558_v45 = vpop.f32.mrb[12].mxu0 }
 0x8ef   :  { %v559_v46 = vadd.f32 %v1514_v44, %v558_v45  ;;  %v1656_v47 = vpop.f32.mrb[13].mxu0 }
 0x8f0   :  { %v561_v49 = vpop.f32.mrb[14].mxu0 }
 0x8f1   :  { %v567_v50 = vmul.f32 0.044715, %v559_v46  ;;  %v562_v51 = vadd.f32 %v1514_v44, %v561_v49  ;;  %v1657_v53 = vpop.f32.mrb[15].mxu0  ;;  %v565_v2 = vmul.f32 0.5, %v559_v46  ;;  %v1525_v44 = vld [vmem:[%s2221_s3 + $0x9] ss:$0 sm:$0xff] }
 0x8f3   :  { %v569_v54 = vmul.f32 %v567_v50, %v559_v46  ;;  %v568_v55 = vmul.f32 0.044715, %v562_v51  ;;  %v566_v3 = vmul.f32 0.5, %v562_v51  ;;  %v1526_v50 = vld [vmem:[%s2221_s3 + $0xa] ss:$0 sm:$0xff] }
 0x8f5   :  { %v571_v56 = vmul.f32 %v569_v54, %v559_v46  ;;  %v570_v57 = vmul.f32 %v568_v55, %v562_v51 }
 0x8f7   :  { %v573_v58 = vadd.f32 %v571_v56, %v559_v46  ;;  %v572_v59 = vmul.f32 %v570_v57, %v562_v51 }
 0x8f9   :  { %v575_v60 = vmul.f32 0.7978846, %v573_v58  ;;  %v574_v61 = vadd.f32 %v572_v59, %v562_v51 }
 0x8fb   :  { %1813 = vtanh.f32 %v575_v60  ;;  %v576_v62 = vmul.f32 0.7978846, %v574_v61 }
 0x8fd   :  { %1815 = vtanh.f32 %v576_v62 }
 0x905   :  { %v1814_v63 = vpop.eup %1813 }
 0x906   :  { %v579_v0 = vadd.f32 1.0, %v1814_v63 }
 0x907   :  { %v1816_v1 = vpop.eup %1815 }
 0x908   :  { %v580_v4 = vadd.f32 1.0, %v1816_v1  ;;  %v581_v5 = vmul.f32 %v579_v0, %v565_v2 }
 0x90a   :  { %v582_v6 = vmul.f32 %v580_v4, %v566_v3 }
 0x90c   :  { %v583_v7 = vpack.c.bf16 %v582_v6, %v581_v5 }
 0x90e   :  { %1667 = vmatmul.mubr.msk.bf16.vlgmr.msra.gmra.mrb[12].mxu1 %vm621_vm3, %v583_v7 }
 0x90f   :  { %1686 = vmatprep.mubr.msk.bf16.mxu1 %vm1852_vm1, %v1851_v15 }
 0x9e1   :  { %v659_v9 = vpop.f32.mrb[12].mxu1 }
 0x9e2   :  { %v660_v10 = vadd.f32 %v1518_v8, %v659_v9  ;;  %v1668_v11 = vpop.f32.mrb[13].mxu1 }
 0x9e3   :  { %v662_v12 = vpop.f32.mrb[14].mxu1 }
 0x9e4   :  { %v663_v13 = vadd.f32 %v1518_v8, %v662_v12  ;;  %v1669_v14 = vpop.f32.mrb[15].mxu1  ;;  %v666_v16 = vadd.f32 %v660_v10, %v497_v37 }
 0x9e6   :  { %v670_v17 = vsel %vm24_vm0, %v666_v16, 0.0  ;;  %v667_v18 = vadd.f32 %v663_v13, %v498_v38 }
 0x9e7   :  { %671 = vadd.xlane.f32.xlu0 %v670_v17 }
 0x9e8   :  { %v673_v19 = vsel %vm24_vm0, %v667_v18, 0.0 }
 0x9e9   :  { %674 = vadd.xlane.f32.xlu1 %v673_v19 }
 0xa74   :  { %v672_v31 = vpop.xlane.xlu0 %671 }
 0xa75   :  { %v676_v32 = vmul.f32 0.03125, %v672_v31 }
 0xa76   :  { %v675_v20 = vpop.xlane.xlu1 %674 }
 0xa77   :  { %v678_v21 = vsub.f32 %v666_v16, %v676_v32  ;;  %v677_v22 = vmul.f32 0.03125, %v675_v20 }
 0xa79   :  { %v679_v23 = vsub.f32 %v667_v18, %v677_v22  ;;  %v680_v24 = vmul.f32 %v678_v21, %v678_v21 }
 0xa7b   :  { %v682_v25 = vsel %vm24_vm0, %v680_v24, 0.0  ;;  %v681_v26 = vmul.f32 %v679_v23, %v679_v23 }
 0xa7c   :  { %683 = vadd.xlane.f32.xlu0 %v682_v25 }
 0xa7d   :  { %v685_v27 = vsel %vm24_vm0, %v681_v26, 0.0 }
 0xa7e   :  { %686 = vadd.xlane.f32.xlu1 %v685_v27 }
 0xb09   :  { %v684_v30 = vpop.xlane.xlu0 %683 }
 0xb0a   :  { %v688_v33 = vmul.f32 0.03125, %v684_v30 }
 0xb0b   :  { %v687_v34 = vpop.xlane.xlu1 %686 }
 0xb0c   :  { %v690_v35 = vadd.f32 1e-12, %v688_v33  ;;  %v689_v36 = vmul.f32 0.03125, %v687_v34 }
 0xb0e   :  { %1817 = vrsqrt.f32 %v690_v35  ;;  %v691_v37 = vadd.f32 1e-12, %v689_v36 }
 0xb10   :  { %1819 = vrsqrt.f32 %v691_v37 }
 0xb18   :  { %v1818_v38 = vpop.eup %1817 }
 0xb19   :  { %v694_v40 = vmul.f32 %v1818_v38, %v678_v21 }
 0xb1a   :  { %v1820_v41 = vpop.eup %1819 }
 0xb1b   :  { %v700_v42 = vmul.f32 %v1524_v39, %v694_v40  ;;  %v695_v43 = vmul.f32 %v1820_v41, %v679_v23 }
 0xb1d   :  { %v701_v45 = vmul.f32 %v1524_v39, %v695_v43  ;;  %v2063_v46 = vadd.f32 %v1525_v44, %v700_v42 }
 0xb1f   :  { %v2065_v47 = vadd.f32 %v1525_v44, %v701_v45 }
 0xb21   :  { %v708_v49 = vpack.c.bf16 %v2065_v47, %v2063_v46 }
 0xb23   :  { %1675 = vmatmul.mubr.msk.bf16.vlgmr.msra.gmra.mrb[16].mxu0 %vm24_vm0, %v708_v49 }
 0xb24   :  { %1680 = vmatprep.mubr.msk.bf16.mxu0 %vm1852_vm1, %v1851_v15 }
 0xbf6   :  { %v767_v51 = vpop.f32.mrb[16].mxu0 }
 0xbf7   :  { %v1676_v53 = vpop.f32.mrb[17].mxu0  ;;  %v768_v55 = vadd.f32 %v1526_v50, %v767_v51 }
 0xbf8   :  { %v770_v54 = vpop.f32.mrb[18].mxu0 }
 0xbf9   :  { %v771_v56 = vadd.f32 %v1526_v50, %v770_v54  ;;  %v1677_v57 = vpop.f32.mrb[19].mxu0 }
 0xbfb   :  { %v2075_v58 = vpack.c.bf16 %v771_v56, %v768_v55 }
 0xbfd   :  { %901 = vrot.lane.b32.xlu1 %v2075_v58, %s1853_s28  ;;  %776 = vrot.lane.b32.xlu0 %v2075_v58, %s1854_s29 }
 0xc01   :  { %899 = vrot.lane.b32.xlu1 %v2075_v58, %s1855_s30 }
 0xc6f   :  { %v777_v59 = vpop.permute.xlu0 %776  ;;  %v902_v61 = vpop.permute.xlu1 %901 }
 0xc70   :  { %v782_v60 = vsel %vm134_vm2, %v777_v59, 0  ;;  %v907_v62 = vsel %vm134_vm2, %v902_v61, 0  ;;  %v1777_v59 = vld [vmem:[%s2220_s2 + $0x60] sm:$0xff]  }
 0xc71   :  { %1679 = vmatpush3.bf16.xpose.msra.mxu0 %v782_v60 }
 0xc72   :  { %1690 = vmatprep.subr.bf16.mxu0 %v1851_v15 }
 0xc73   :  { %v900_v63 = vpop.permute.xlu1 %899 }
 0xc78   :  { %1681 = vmatmul.mubr.msk.bf16.vlgmr.msra.gmra.mrb[20].mxu0 %vm134_vm2, %v2075_v58 }
 0xc79   :  { %1691 = vmatpush3.bf16.xpose.msra.mxu0 %v907_v62  ;;  %1692 = vmatprep.mubr.msk.bf16.mxu0 %vm1852_vm1, %v1851_v15 }
 0xc7a   :  { %1702 = vmatprep.subr.bf16.mxu0 %v1851_v15 }
 0xc80   :  { %1693 = vmatmul.mubr.msk.bf16.vlgmr.msra.gmra.mrb[24].mxu0 %vm134_vm2, %v900_v63 }
 0xc81   :  { %1706 = vmatprep.mubr.msk.bf16.mxu0 %vm1852_vm1, %v1851_v15  ;;  %1703 = vmatpush3.bf16.msra.mxu0 %v1777_v59 }
 0xc82   :  { %1704 = vmatprep.subr.bf16.mxu0 %v1851_v15 }
 0xd4b   :  { %v818_v0 = vpop.f32.mrb[20].mxu0 }
 0xd4c   :  { %v825_v1 = vmul.f32 0.25, %v818_v0  ;;  %v1682_v2 = vpop.f32.mrb[21].mxu0  ;;  %v1778_v0 = vld [vmem:[%s2220_s2 + $0x68] sm:$0xff]  }
 0xd4d   :  { %v821_v3 = vpop.f32.mrb[22].mxu0  ;;  %1705 = vmatpush3.bf16.msra.mxu0 %v1778_v0 }
 0xd4e   :  { %v826_v4 = vmul.f32 0.25, %v821_v3  ;;  %v1683_v5 = vpop.f32.mrb[23].mxu0  ;;  %v827_v6 = vadd.f32 %v825_v1, %v1949_v48  ;;  %1718 = vmatprep.subr.bf16.mxu0 %v1851_v15 }
 0xd50   :  { %v829_v7 = vsel %vm134_vm2, %v827_v6, -inf  ;;  %v828_v8 = vadd.f32 %v826_v4, %v1954_v52 }
 0xd51   :  { %830 = vmax.xlane.f32.xlu1 %v829_v7 }
 0xd52   :  { %v832_v9 = vsel %vm134_vm2, %v828_v8, -inf }
 0xd53   :  { %833 = vmax.xlane.f32.xlu0 %v832_v9  ;;  %v943_v10 = vpop.f32.mrb[24].mxu0 }
 0xd54   :  { %v950_v11 = vmul.f32 0.25, %v943_v10  ;;  %v1694_v12 = vpop.f32.mrb[25].mxu0 }
 0xd55   :  { %v946_v13 = vpop.f32.mrb[26].mxu0  ;;  %v1534_v12 = vld [vmem:[%s2221_s3 + $0xb] ss:$0 sm:$0xff] }
 0xd56   :  { %v951_v14 = vmul.f32 0.25, %v946_v13  ;;  %v1695_v16 = vpop.f32.mrb[27].mxu0  ;;  %v952_v17 = vadd.f32 %v950_v11, %v1949_v48 }
 0xd58   :  { %v954_v18 = vsel %vm134_vm2, %v952_v17, -inf  ;;  %v953_v19 = vadd.f32 %v951_v14, %v1954_v52 }
 0xd59   :  { %955 = vmax.xlane.f32.xlu0 %v954_v18 }
 0xd5a   :  { %v957_v31 = vsel %vm134_vm2, %v953_v19, -inf }
 0xd5d   :  { %958 = vmax.xlane.f32.xlu0 %v957_v31 }
 0xdde   :  { %v831_v32 = vpop.xlane.xlu1 %830 }
 0xddf   :  { %v835_v20 = vsub.f32 %v827_v6, %v831_v32 }
 0xde0   :  { %v834_v21 = vpop.xlane.xlu0 %833 }
 0xde1   :  { %v837_v22 = vmul.f32 1.442695, %v835_v20  ;;  %v836_v23 = vsub.f32 %v828_v8, %v834_v21 }
 0xde3   :  { %1821 = vpow2.f32 %v837_v22  ;;  %v839_v24 = vmul.f32 1.442695, %v836_v23 }
 0xde5   :  { %1823 = vpow2.f32 %v839_v24 }
 0xde6   :  { %v956_v25 = vpop.xlane.xlu0 %955 }
 0xde7   :  { %v960_v26 = vsub.f32 %v952_v17, %v956_v25 }
 0xde9   :  { %v962_v27 = vmul.f32 1.442695, %v960_v26 }
 0xdea   :  { %v959_v48 = vpop.xlane.xlu0 %958 }
 0xdeb   :  { %1825 = vpow2.f32 %v962_v27  ;;  %v961_v28 = vsub.f32 %v953_v19, %v959_v48 }
 0xded   :  { %v1822_v29 = vpop.eup %1821  ;;  %v964_v52 = vmul.f32 1.442695, %v961_v28 }
 0xdee   :  { %v841_v30 = vsel %vm134_vm2, %v1822_v29, 0.0 }
 0xdef   :  { %v1824_v33 = vpop.eup %1823  ;;  %1827 = vpow2.f32 %v964_v52  ;;  %842 = vadd.xlane.f32.xlu1 %v841_v30  ;;  %v1780_v52 = vld [vmem:[%s2220_s2 + $0x78] sm:$0xff]  }
 0xdf0   :  { %v844_v34 = vsel %vm134_vm2, %v1824_v33, 0.0 }
 0xdf1   :  { %845 = vadd.xlane.f32.xlu0 %v844_v34 }
 0xdf5   :  { %v1826_v35 = vpop.eup %1825 }
 0xdf6   :  { %v966_v36 = vsel %vm134_vm2, %v1826_v35, 0.0 }
 0xdf7   :  { %967 = vadd.xlane.f32.xlu1 %v966_v36 }
 0xdf9   :  { %v1828_v37 = vpop.eup %1827 }
 0xdfa   :  { %v969_v38 = vsel %vm134_vm2, %v1828_v37, 0.0 }
 0xdfb   :  { %970 = vadd.xlane.f32.xlu0 %v969_v38 }
 0xe08   :  { %852 = vrot.lane.b32.xlu1 %v2075_v58, %s1856_s1 }
 0xe11   :  { %977 = vrot.lane.b32.xlu0 %v2075_v58, %s1857_s9 }
 0xe7c   :  { %v843_v39 = vpop.xlane.xlu1 %842 }
 0xe7d   :  { %1829 = vrcp.f32 %v843_v39  ;;  %v1538_v39 = vld [vmem:[%s2221_s3 + $0xc] ss:$0 sm:$0xff] }
 0xe7e   :  { %v846_v40 = vpop.xlane.xlu0 %845 }
 0xe7f   :  { %1831 = vrcp.f32 %v846_v40 }
 0xe84   :  { %v968_v41 = vpop.xlane.xlu1 %967 }
 0xe85   :  { %1833 = vrcp.f32 %v968_v41 }
 0xe87   :  { %v1830_v42 = vpop.eup %1829 }
 0xe88   :  { %v853_v43 = vpop.permute.xlu1 %852  ;;  %v971_v44 = vpop.xlane.xlu0 %970  ;;  %v849_v49 = vmul.f32 %v1830_v42, %v1822_v29 }
 0xe89   :  { %v1832_v45 = vpop.eup %1831  ;;  %1835 = vrcp.f32 %v971_v44  ;;  %1685 = vmatpush3.bf16.msra.mxu1 %v853_v43  ;;  %v1539_v44 = vld [vmem:[%s2221_s3 + $0xd] ss:$0 sm:$0xff] }
 0xe8a   :  { %v850_v50 = vmul.f32 %v1832_v45, %v1824_v33  ;;  %1696 = vmatprep.subr.bf16.mxu1 %v1851_v15 }
 0xe8c   :  { %v978_v51 = vpop.permute.xlu0 %977  ;;  %v851_v53 = vpack.c.bf16 %v850_v50, %v849_v49 }
 0xe8e   :  { %1687 = vmatmul.mubr.msk.bf16.vlgmr.msra.gmra.mrb[16].mxu1 %vm134_vm2, %v851_v53  ;;  %v1781_v53 = vld [vmem:[%s2220_s2 + $0x80] sm:$0xff]  }
 0xe8f   :  { %1697 = vmatpush3.bf16.msra.mxu1 %v978_v51  ;;  %1698 = vmatprep.mubr.msk.bf16.mxu1 %vm1852_vm1, %v1851_v15  ;;  %v1834_v54 = vpop.eup %1833 }
 0xe90   :  { %1710 = vmatprep.subr.bf16.mxu1 %v1851_v15  ;;  %v974_v56 = vmul.f32 %v1834_v54, %v1826_v35  ;;  %v1782_v54 = vld [vmem:[%s2220_s2 + $0x88] sm:$0xff]  }
 0xe93   :  { %v1836_v55 = vpop.eup %1835 }
 0xe94   :  { %v975_v57 = vmul.f32 %v1836_v55, %v1828_v37  ;;  %v1783_v55 = vld [vmem:[%s2220_s2 + $0x90] sm:$0xff]  }
 0xe96   :  { %v976_v58 = vpack.c.bf16 %v975_v57, %v974_v56  ;;  %v1784_v56 = vld [vmem:[%s2220_s2 + $0x98] sm:$0xff]   ;;  %v1540_v57 = vld [vmem:[%s2221_s3 + $0xe] ss:$0 sm:$0xff] }
 0xe98   :  { %1699 = vmatmul.mubr.msk.bf16.vlgmr.msra.gmra.mrb[20].mxu1 %vm134_vm2, %v976_v58 }
 0xe99   :  { %1714 = vmatprep.mubr.msk.bf16.mxu1 %vm1852_vm1, %v1851_v15 }
 0xf61   :  { %v892_v60 = vpop.f32.mrb[16].mxu1 }
 0xf62   :  { %v1688_v61 = vpop.f32.mrb[17].mxu1 }
 0xf63   :  { %v895_v62 = vpop.f32.mrb[18].mxu1 }
 0xf64   :  { %v1689_v63 = vpop.f32.mrb[19].mxu1 }
 0xf6b   :  { %v1017_v1 = vpop.f32.mrb[20].mxu1 }
 0xf6c   :  { %v1700_v2 = vpop.f32.mrb[21].mxu1 }
 0xf6d   :  { %v1020_v3 = vpop.f32.mrb[22].mxu1 }
 0xf6e   :  { %v1760_v4 = vpack.i.bf16 %v1020_v3, %v1017_v1  ;;  %v1701_v5 = vpop.f32.mrb[23].mxu1 }
 0xf70   :  { %1761 = vrot.lane.b32.xlu1 %v1760_v4, %s1858_s14 }
 0xfe2   :  { %v1762_v6 = vpop.permute.xlu1 %1761 }
 0xfe3   :  { %v1764_v7 = vunpack.i.h.bf16 %v1762_v6  ;;  %v1763_v8 = vunpack.i.l.bf16 %v1762_v6 }
 0xfe5   :  { %v1033_v9 = vsel %vm134_vm2, %v895_v62, %v1764_v7  ;;  %v1032_v10 = vsel %vm134_vm2, %v892_v60, %v1763_v8 }
 0xfe6   :  { %v1034_v11 = vpack.c.bf16 %v1033_v9, %v1032_v10 }
 0xfe8   :  { %1707 = vmatmul.mubr.msk.bf16.vlgmr.msra.gmra.mrb[28].mxu0 %vm24_vm0, %v1034_v11 }
 0xfe9   :  { %1726 = vmatprep.mubr.msk.bf16.mxu0 %vm1852_vm1, %v1851_v15  ;;  %1719 = vmatpush3.bf16.msra.mxu0 %v1781_v53 }
 0xfea   :  { %1720 = vmatprep.subr.bf16.mxu0 %v1851_v15 }
 0xfed   :  { %1721 = vmatpush3.bf16.msra.mxu0 %v1782_v54 }
 0xfee   :  { %1722 = vmatprep.subr.bf16.mxu0 %v1851_v15 }
 0xff1   :  { %1723 = vmatpush3.bf16.msra.mxu0 %v1783_v55 }
 0xff2   :  { %1724 = vmatprep.subr.bf16.mxu0 %v1851_v15 }
 0xff5   :  { %1725 = vmatpush3.bf16.msra.mxu0 %v1784_v56  ;;  %v1551_v56 = vld [vmem:[%s2221_s3 + $0x11] ss:$0 sm:$0xff] }
0x10bb   :  { %v1093_v13 = vpop.f32.mrb[28].mxu0 }
0x10bc   :  { %v1094_v14 = vadd.f32 %v1534_v12, %v1093_v13  ;;  %v1708_v16 = vpop.f32.mrb[29].mxu0 }
0x10bd   :  { %v1096_v17 = vpop.f32.mrb[30].mxu0 }
0x10be   :  { %v1097_v18 = vadd.f32 %v1534_v12, %v1096_v17  ;;  %v1709_v19 = vpop.f32.mrb[31].mxu0  ;;  %v1100_v31 = vadd.f32 %v1094_v14, %v2063_v46 }
0x10c0   :  { %v1104_v32 = vsel %vm24_vm0, %v1100_v31, 0.0  ;;  %v1101_v20 = vadd.f32 %v1097_v18, %v2065_v47  ;;  %v1779_v47 = vld [vmem:[%s2220_s2 + $0x70] sm:$0xff]  }
0x10c1   :  { %1105 = vadd.xlane.f32.xlu1 %v1104_v32  ;;  %1711 = vmatpush3.bf16.msra.mxu1 %v1779_v47 }
0x10c2   :  { %v1107_v21 = vsel %vm24_vm0, %v1101_v20, 0.0  ;;  %1712 = vmatprep.subr.bf16.mxu1 %v1851_v15 }
0x10c3   :  { %1108 = vadd.xlane.f32.xlu0 %v1107_v21 }
0x10c5   :  { %1713 = vmatpush3.bf16.msra.mxu1 %v1780_v52 }
0x10c6   :  { %1730 = vmatprep.subr.bf16.mxu1 %v1851_v15 }
0x114e   :  { %v1106_v22 = vpop.xlane.xlu1 %1105 }
0x114f   :  { %v1110_v23 = vmul.f32 0.03125, %v1106_v22 }
0x1150   :  { %v1109_v24 = vpop.xlane.xlu0 %1108 }
0x1151   :  { %v1112_v25 = vsub.f32 %v1100_v31, %v1110_v23  ;;  %v1111_v26 = vmul.f32 0.03125, %v1109_v24  ;;  %v1544_v31 = vld [vmem:[%s2221_s3 + $0xf] ss:$0 sm:$0xff] }
0x1153   :  { %v1113_v27 = vsub.f32 %v1101_v20, %v1111_v26  ;;  %v1114_v48 = vmul.f32 %v1112_v25, %v1112_v25 }
0x1155   :  { %v1116_v28 = vsel %vm24_vm0, %v1114_v48, 0.0  ;;  %v1115_v29 = vmul.f32 %v1113_v27, %v1113_v27 }
0x1156   :  { %1117 = vadd.xlane.f32.xlu0 %v1116_v28 }
0x1157   :  { %v1119_v46 = vsel %vm24_vm0, %v1115_v29, 0.0 }
0x1158   :  { %1120 = vadd.xlane.f32.xlu1 %v1119_v46 }
0x11e3   :  { %v1118_v30 = vpop.xlane.xlu0 %1117 }
0x11e4   :  { %v1122_v33 = vmul.f32 0.03125, %v1118_v30 }
0x11e5   :  { %v1121_v34 = vpop.xlane.xlu1 %1120 }
0x11e6   :  { %v1124_v35 = vadd.f32 1e-12, %v1122_v33  ;;  %v1123_v36 = vmul.f32 0.03125, %v1121_v34 }
0x11e8   :  { %1837 = vrsqrt.f32 %v1124_v35  ;;  %v1125_v37 = vadd.f32 1e-12, %v1123_v36 }
0x11ea   :  { %1839 = vrsqrt.f32 %v1125_v37  ;;  %v1785_v37 = vld [vmem:[%s2220_s2 + $0xa0] sm:$0xff]  }
0x11f2   :  { %v1838_v38 = vpop.eup %1837 }
0x11f3   :  { %v1128_v40 = vmul.f32 %v1838_v38, %v1112_v25  ;;  %v1786_v38 = vld [vmem:[%s2220_s2 + $0xa8] sm:$0xff]  }
0x11f4   :  { %v1840_v41 = vpop.eup %1839 }
0x11f5   :  { %v1134_v42 = vmul.f32 %v1538_v39, %v1128_v40  ;;  %v1129_v43 = vmul.f32 %v1840_v41, %v1113_v27 }
0x11f7   :  { %v1135_v45 = vmul.f32 %v1538_v39, %v1129_v43  ;;  %v1140_v49 = vadd.f32 %v1539_v44, %v1134_v42 }
0x11f9   :  { %v1141_v50 = vadd.f32 %v1539_v44, %v1135_v45 }
0x11fb   :  { %v1142_v51 = vpack.c.bf16 %v1141_v50, %v1140_v49 }
0x11fd   :  { %1715 = vmatmul.mubr.msk.bf16.vlgmr.msra.gmra.mrb[24].mxu1 %vm24_vm0, %v1142_v51  ;;  %v1550_v51 = vld [vmem:[%s2221_s3 + $0x10] ss:$0 sm:$0xff] }
0x11fe   :  { %1734 = vmatprep.mubr.msk.bf16.mxu1 %vm1852_vm1, %v1851_v15  ;;  %1731 = vmatpush3.bf16.msra.mxu1 %v1785_v37 }
0x11ff   :  { %1732 = vmatprep.subr.bf16.mxu1 %v1851_v15 }
0x1202   :  { %1733 = vmatpush3.bf16.msra.mxu1 %v1786_v38 }
0x1203   :  { %1738 = vmatprep.subr.bf16.mxu1 %v1851_v15 }
0x12d0   :  { %v1201_v58 = vpop.f32.mrb[24].mxu1 }
0x12d1   :  { %v1202_v59 = vadd.f32 %v1540_v57, %v1201_v58  ;;  %v1716_v60 = vpop.f32.mrb[25].mxu1 }
0x12d2   :  { %v1204_v61 = vpop.f32.mrb[26].mxu1 }
0x12d3   :  { %v1210_v62 = vmul.f32 0.044715, %v1202_v59  ;;  %v1205_v63 = vadd.f32 %v1540_v57, %v1204_v61  ;;  %v1717_v0 = vpop.f32.mrb[27].mxu1  ;;  %v1208_v13 = vmul.f32 0.5, %v1202_v59 }
0x12d4   :  { %v1552_v0 = vld [vmem:[%s2221_s3 + $0x12] ss:$0 sm:$0xff] }
0x12d5   :  { %v1212_v1 = vmul.f32 %v1210_v62, %v1202_v59  ;;  %v1211_v2 = vmul.f32 0.044715, %v1205_v63  ;;  %v1209_v14 = vmul.f32 0.5, %v1205_v63  ;;  %v1787_v62 = vld [vmem:[%s2220_s2 + $0xb0] sm:$0xff]  }
0x12d7   :  { %v1214_v3 = vmul.f32 %v1212_v1, %v1202_v59  ;;  %v1213_v4 = vmul.f32 %v1211_v2, %v1205_v63 }
0x12d9   :  { %v1216_v5 = vadd.f32 %v1214_v3, %v1202_v59  ;;  %v1215_v6 = vmul.f32 %v1213_v4, %v1205_v63 }
0x12db   :  { %v1218_v7 = vmul.f32 0.7978846, %v1216_v5  ;;  %v1217_v8 = vadd.f32 %v1215_v6, %v1205_v63  ;;  %v1788_v63 = vld [vmem:[%s2220_s2 + $0xb8] sm:$0xff]   ;;  %s1859_s2 = smov 32  }
0x12dd   :  { %1841 = vtanh.f32 %v1218_v7  ;;  %v1219_v9 = vmul.f32 0.7978846, %v1217_v8  ;;  %v1556_v8 = vld [vmem:[%s2221_s3 + $0x13] ss:$0 sm:$0xff] }
0x12df   :  { %1843 = vtanh.f32 %v1219_v9 }
0x12e7   :  { %v1842_v10 = vpop.eup %1841 }
0x12e8   :  { %v1222_v11 = vadd.f32 1.0, %v1842_v10 }
0x12e9   :  { %v1844_v12 = vpop.eup %1843 }
0x12ea   :  { %v1223_v16 = vadd.f32 1.0, %v1844_v12  ;;  %v1224_v17 = vmul.f32 %v1222_v11, %v1208_v13 }
0x12ec   :  { %v1225_v18 = vmul.f32 %v1223_v16, %v1209_v14 }
0x12ee   :  { %v1226_v19 = vpack.c.bf16 %v1225_v18, %v1224_v17 }
0x12f0   :  { %1727 = vmatmul.mubr.msk.bf16.vlgmr.msra.gmra.mrb[32].mxu0 %vm621_vm3, %v1226_v19 }
0x13c3   :  { %v1301_v32 = vpop.f32.mrb[32].mxu0 }
0x13c4   :  { %v1302_v20 = vadd.f32 %v1544_v31, %v1301_v32  ;;  %v1728_v21 = vpop.f32.mrb[33].mxu0 }
0x13c5   :  { %v1304_v22 = vpop.f32.mrb[34].mxu0 }
0x13c6   :  { %v1305_v23 = vadd.f32 %v1544_v31, %v1304_v22  ;;  %v1729_v24 = vpop.f32.mrb[35].mxu0  ;;  %v1308_v25 = vadd.f32 %v1302_v20, %v1140_v49 }
0x13c8   :  { %v1312_v26 = vsel %vm24_vm0, %v1308_v25, 0.0  ;;  %v1309_v27 = vadd.f32 %v1305_v23, %v1141_v50 }
0x13c9   :  { %1313 = vadd.xlane.f32.xlu1 %v1312_v26 }
0x13ca   :  { %v1315_v48 = vsel %vm24_vm0, %v1309_v27, 0.0 }
0x13cb   :  { %1316 = vadd.xlane.f32.xlu0 %v1315_v48 }
0x1456   :  { %v1314_v28 = vpop.xlane.xlu1 %1313 }
0x1457   :  { %v1318_v29 = vmul.f32 0.03125, %v1314_v28 }
0x1458   :  { %v1317_v46 = vpop.xlane.xlu0 %1316 }
0x1459   :  { %v1320_v47 = vsub.f32 %v1308_v25, %v1318_v29  ;;  %v1319_v52 = vmul.f32 0.03125, %v1317_v46 }
0x145b   :  { %v1321_v30 = vsub.f32 %v1309_v27, %v1319_v52  ;;  %v1322_v33 = vmul.f32 %v1320_v47, %v1320_v47 }
0x145d   :  { %v1324_v34 = vsel %vm24_vm0, %v1322_v33, 0.0  ;;  %v1323_v35 = vmul.f32 %v1321_v30, %v1321_v30 }
0x145e   :  { %1325 = vadd.xlane.f32.xlu1 %v1324_v34 }
0x145f   :  { %v1327_v36 = vsel %vm24_vm0, %v1323_v35, 0.0 }
0x1460   :  { %1328 = vadd.xlane.f32.xlu0 %v1327_v36 }
0x14eb   :  { %v1326_v39 = vpop.xlane.xlu1 %1325 }
0x14ec   :  { %v1330_v40 = vmul.f32 0.03125, %v1326_v39 }
0x14ed   :  { %v1329_v41 = vpop.xlane.xlu0 %1328 }
0x14ee   :  { %v1332_v42 = vadd.f32 1e-12, %v1330_v40  ;;  %v1331_v43 = vmul.f32 0.03125, %v1329_v41 }
0x14f0   :  { %1845 = vrsqrt.f32 %v1332_v42  ;;  %v1333_v44 = vadd.f32 1e-12, %v1331_v43 }
0x14f2   :  { %1847 = vrsqrt.f32 %v1333_v44 }
0x14fa   :  { %v1846_v45 = vpop.eup %1845 }
0x14fb   :  { %v1336_v49 = vmul.f32 %v1846_v45, %v1320_v47 }
0x14fc   :  { %v1848_v50 = vpop.eup %1847 }
0x14fd   :  { %v1337_v53 = vmul.f32 %v1848_v50, %v1321_v30  ;;  %v1342_v54 = vmul.f32 %v1550_v51, %v1336_v49 }
0x14ff   :  { %v1343_v55 = vmul.f32 %v1550_v51, %v1337_v53  ;;  %v1348_v58 = vadd.f32 %v1551_v56, %v1342_v54 }
0x1501   :  { %v1349_v57 = vadd.f32 %v1551_v56, %v1343_v55 }
0x1503   :  { %v1351_v59 = vrot.slane %v1349_v57, 7 }
0x1505   :  { %v1354_v60 = vsel %vm1353_vm4, %v1348_v58, %v1351_v59 }
0x1506   :  { %v1355_v61 = vpack.c.bf16 %v1354_v60, %v1354_v60 }
0x1508   :  { %1735 = vmatmul.mubr.msk.bf16.vlgmr.msra.gmra.mrb[28].mxu1 %vm24_vm0, %v1355_v61 }
0x1509   :  { %1742 = vmatprep.mubr.msk.bf16.mxu1 %vm1852_vm1, %v1851_v15  ;;  %1739 = vmatpush3.bf16.msra.mxu1 %v1787_v62 }
0x150a   :  { %1740 = vmatprep.subr.bf16.mxu1 %v1851_v15 }
0x150d   :  { %1741 = vmatpush3.bf16.msra.mxu1 %v1788_v63 }
0x15db   :  { %v1414_v1 = vpop.f32.mrb[28].mxu1 }
0x15dc   :  { %v1415_v2 = vadd.f32 %v1552_v0, %v1414_v1  ;;  %v1736_v3 = vpop.f32.mrb[29].mxu1 }
0x15dd   :  { %v1417_v4 = vpop.f32.mrb[30].mxu1 }
0x15de   :  { %1849 = vtanh.f32 %v1415_v2  ;;  %v1737_v5 = vpop.f32.mrb[31].mxu1 }
0x15e8   :  { %v1850_v6 = vpop.eup %1849 }
0x15e9   :  { %v1421_v7 = vpack.c.bf16 %v1850_v6, %v1850_v6 }
0x15eb   :  { %1743 = vmatmul.mubr.msk.bf16.vlgmr.msra.gmra.mrb[32].mxu1 %vm24_vm0, %v1421_v7 }
0x16be   :  { %v1480_v15 = vpop.f32.mrb[32].mxu1 }
0x16bf   :  { %v1481_v9 = vadd.f32 %v1556_v8, %v1480_v15  ;;  %v1744_v10 = vpop.f32.mrb[33].mxu1 }
0x16c0   :  { %v1483_v11 = vpop.f32.mrb[34].mxu1 }
0x16c1   :  { %1487 = vrot.lane.b32.xlu0 %v1481_v9, %s1859_s2  ;;  %v1745_v12 = vpop.f32.mrb[35].mxu1 }
0x1733   :  { %v1488_v13 = vpop.permute.xlu0 %1487 }
0x1734   :  { %v1490_v14 = vsel %vm24_vm0, %v1850_v6, %v1488_v13 }
0x1735   :  { %v1492_v16 = vsel %vm1491_vm5, %v1490_v14, 0.0 }
0x1736   :  { %1493 = vst [vmem:[%s2223_s4] sm:$0x3] %v1492_v16 }

</bundles_post_ra>
